<compile_context>
chip_gen: v5e
topology: v5e:2x2
jax: 0.10.0
libtpu: 0.0.40
codegen_flags: <defaults>
</compile_context>

<pallas_src>
import functools

import jax
import jax.numpy as jnp
from jax.experimental import pallas as pl
from jax.experimental.pallas import tpu as pltpu

# ----------------------------- config (small) ------------------------------
B = 2            # batch
S = 8            # sequence length
H = 32           # hidden size
NUM_HEADS = 4    # attention heads
DH = H // NUM_HEADS
FFN = 64         # intermediate size
VOCAB = 64       # vocab size
NUM_LAYERS = 2   # encoder layers
NUM_CLASSES = 6  # output_layer out_features
LN_EPS = 1e-5


# ------------------------------ kernel helpers -----------------------------
def _layer_norm(x, g, b, eps=LN_EPS):
    # var = E[x^2] - mu^2: two independent lane reductions (shorter XLU chain).
    mu = jnp.mean(x, axis=-1, keepdims=True)
    ms = jnp.mean(x * x, axis=-1, keepdims=True)
    var = ms - mu * mu
    return (x - mu) * jax.lax.rsqrt(var + eps) * g + b


# --------------------------- fused forward kernel ---------------------------
def fused_forward_kernel(emb_ref, negb_ref, misc_ref, vecs_ref,
                         wqkv_ref, wo_ref, w1_ref, w2_ref, whead_ref,
                         out_ref, *, batch, seq, num_heads, num_layers):
    bf16 = jnp.bfloat16
    f32 = jnp.float32
    n = batch * seq
    hid = emb_ref.shape[-1]
    dh = hid // num_heads
    ffn = w1_ref.shape[-1]

    neg_bias = negb_ref[...]                      # (B*nh, 1, S) additive key mask

    # --- embeddings + positional + embedding LayerNorm (batch folded in rows) ---
    x = emb_ref[...] + misc_ref[0:n, :]           # (B*S, H)
    x = _layer_norm(x, misc_ref[n:n + 1, :], misc_ref[n + 1:n + 2, :])

    for l in range(num_layers):                   # static unroll; weights VMEM-resident
        vec = vecs_ref[l]                         # (8, 3H) per-layer vector slab (f32)
        bqkv = vec[0:1, :]
        bo = vec[1:2, 0:hid]
        g1 = vec[2:3, 0:hid]
        b1 = vec[3:4, 0:hid]
        c1 = vec[4:5, 0:ffn]
        c2 = vec[5:6, 0:hid]
        g2 = vec[6:7, 0:hid]
        b2 = vec[7:8, 0:hid]

        # --- single fused QKV projection: (B*S,H) @ (H,3H); 1/sqrt(dh) pre-folded in Q ---
        qkv = jnp.dot(x.astype(bf16), wqkv_ref[l],
                      preferred_element_type=f32) + bqkv            # (B*S, 3H)

        # --- split (batch, head) with static slices only (no relayout primitives) ---
        q_parts, k_parts, v_parts = [], [], []
        for b in range(batch):
            rows = qkv[b * seq:(b + 1) * seq, :]                    # (S, 3H)
            for h in range(num_heads):
                c0 = h * dh
                q_parts.append(rows[:, c0:c0 + dh])
                k_parts.append(rows[:, hid + c0:hid + c0 + dh])
                v_parts.append(rows[:, 2 * hid + c0:2 * hid + c0 + dh])
        q3 = jnp.stack(q_parts).astype(bf16)                        # (B*nh, S, dh)
        k3 = jnp.stack(k_parts).astype(bf16)
        v3 = jnp.stack(v_parts).astype(bf16)

        # --- attention, batched over (batch*heads) ---
        scores = jnp.einsum('hqd,hkd->hqk', q3, k3,
                            preferred_element_type=f32)             # (B*nh, S, S)
        scores = scores + neg_bias
        scores = scores - jnp.max(scores, axis=-1, keepdims=True)
        p = jnp.exp(scores)
        p = p * pl.reciprocal(jnp.sum(p, axis=-1, keepdims=True), approx=True)

        ctx3 = jnp.einsum('hqk,hkd->hqd', p.astype(bf16), v3,
                          preferred_element_type=f32)               # (B*nh, S, dh)

        # --- merge heads (head-major lanes), ONE (B*S,H)@(H,H) output projection ---
        ctx = jnp.concatenate(
            [jnp.concatenate([ctx3[b * num_heads + h] for h in range(num_heads)],
                             axis=-1)
             for b in range(batch)], axis=0)                        # (B*S, H)
        attn_out = jnp.dot(ctx.astype(bf16), wo_ref[l],
                           preferred_element_type=f32) + bo

        h1 = _layer_norm(x + attn_out, g1, b1)

        # --- FFN ---
        ff = jnp.dot(h1.astype(bf16), w1_ref[l],
                     preferred_element_type=f32) + c1
        # TODO(synk): HF Longformer uses exact erf-based GELU; tanh approximation used.
        ff = jax.nn.gelu(ff, approximate=True)
        ff = jnp.dot(ff.astype(bf16), w2_ref[l],
                     preferred_element_type=f32) + c2

        x = _layer_norm(h1 + ff, g2, b2)

    # --- pooler ([CLS] rows) + classification head + sigmoid ---
    bp = misc_ref[n + 2:n + 3, :]
    bc = misc_ref[n + 3:n + 4, :]
    cls = jnp.concatenate([x[b * seq:b * seq + 1, :] for b in range(batch)], axis=0)
    pooled = jnp.tanh(jnp.dot(cls.astype(bf16), whead_ref[0],
                              preferred_element_type=f32) + bp)     # (B, H)
    logits = jnp.dot(pooled.astype(bf16), whead_ref[1],
                     preferred_element_type=f32) + bc               # (B, H), first C valid
    probs = jax.nn.sigmoid(logits)                                  # F.sigmoid
    # single merged epilogue store: rows [pooled_b0..pooled_bB-1, probs_b0..probs_bB-1]
    out_ref[...] = jnp.concatenate([pooled, probs], axis=0)


# ------------------------------ pallas wrapper ------------------------------
def _full_spec(a):
    nd = a.ndim
    return pl.BlockSpec(a.shape, lambda i, _nd=nd: (0,) * _nd)


def fused_forward(emb2d, neg_bias, packed):
    hid = emb2d.shape[-1]
    operands = (emb2d, neg_bias, packed["misc"], packed["layer_vecs"],
                packed["wqkv"], packed["wo"], packed["w1"], packed["w2"],
                packed["whead"])
    return pl.pallas_call(
        functools.partial(fused_forward_kernel, batch=B, seq=S,
                          num_heads=NUM_HEADS, num_layers=NUM_LAYERS),
        out_shape=jax.ShapeDtypeStruct((2 * B, hid), jnp.float32),
        grid=(1,),    # one step: no serial per-batch grid on single-TC chips
        in_specs=[_full_spec(a) for a in operands],
        out_specs=pl.BlockSpec((2 * B, hid), lambda i: (0, 0)),
        compiler_params=pltpu.CompilerParams(
            dimension_semantics=("arbitrary",)),
    )(*operands)


# ------------------------------ parameter init ------------------------------
def init_params(key):
    def dense(k, din, dout):
        return (0.02 * jax.random.normal(k, (din, dout), jnp.float32),
                jnp.zeros((1, dout), jnp.float32))

    keys = iter(jax.random.split(key, 64))
    params = {}
    params["tok_emb"] = 0.02 * jax.random.normal(next(keys), (VOCAB, H), jnp.float32)
    params["pos_emb"] = 0.02 * jax.random.normal(next(keys), (S, H), jnp.float32)
    params["emb_ln_g"] = jnp.ones((1, H), jnp.float32)
    params["emb_ln_b"] = jnp.zeros((1, H), jnp.float32)

    layers = []
    for _ in range(NUM_LAYERS):
        wq, bq = dense(next(keys), H, H)
        wk, bk = dense(next(keys), H, H)
        wv, bv = dense(next(keys), H, H)
        wo, bo = dense(next(keys), H, H)
        g1, be1 = jnp.ones((1, H), jnp.float32), jnp.zeros((1, H), jnp.float32)
        w1, bf1 = dense(next(keys), H, FFN)
        w2, bf2 = dense(next(keys), FFN, H)
        g2, be2 = jnp.ones((1, H), jnp.float32), jnp.zeros((1, H), jnp.float32)
        layers.append(dict(wq=wq, bq=bq, wk=wk, bk=bk, wv=wv, bv=bv,
                           wo=wo, bo=bo, g1=g1, be1=be1,
                           w1=w1, bf1=bf1, w2=w2, bf2=bf2, g2=g2, be2=be2))
    params["layers"] = layers

    params["pooler_w"], params["pooler_b"] = dense(next(keys), H, H)
    params["cls_w"], params["cls_b"] = dense(next(keys), H, NUM_CLASSES)
    return params


def pack_params(params):
    """Host-side packing: fused QKV columns, few lane-dense slabs, bf16 MXU weights."""
    bf16 = jnp.bfloat16
    scale = 1.0 / (DH ** 0.5)
    width = 3 * H

    def pad_lanes(v, w):
        return jnp.pad(v, ((0, 0), (0, w - v.shape[1])))

    wqkv_l, wo_l, w1_l, w2_l, vec_l = [], [], [], [], []
    for lp in params["layers"]:
        # fold 1/sqrt(dh) softmax scale into the Q projection (weights + bias)
        wqkv_l.append(jnp.concatenate([lp["wq"] * scale, lp["wk"], lp["wv"]], axis=1))
        wo_l.append(lp["wo"])
        w1_l.append(lp["w1"])
        w2_l.append(lp["w2"])
        bqkv = jnp.concatenate([lp["bq"] * scale, lp["bk"], lp["bv"]], axis=1)  # (1, 3H)
        rows = [bqkv,
                pad_lanes(lp["bo"], width), pad_lanes(lp["g1"], width),
                pad_lanes(lp["be1"], width), pad_lanes(lp["bf1"], width),
                pad_lanes(lp["bf2"], width), pad_lanes(lp["g2"], width),
                pad_lanes(lp["be2"], width)]
        vec_l.append(jnp.concatenate(rows, axis=0))                  # (8, 3H)

    misc = jnp.concatenate([
        jnp.tile(params["pos_emb"], (B, 1)),                         # rows 0..B*S-1
        params["emb_ln_g"], params["emb_ln_b"],                      # rows B*S, B*S+1
        params["pooler_b"],                                          # row  B*S+2
        pad_lanes(params["cls_b"], H)], axis=0)                      # row  B*S+3

    whead = jnp.stack([params["pooler_w"],
                       jnp.pad(params["cls_w"], ((0, 0), (0, H - NUM_CLASSES)))]
                      ).astype(bf16)                                 # (2, H, H)

    return {
        "misc": misc,                                                # (B*S+4, H) f32
        "layer_vecs": jnp.stack(vec_l),                              # (L, 8, 3H) f32
        "wqkv": jnp.stack(wqkv_l).astype(bf16),                      # (L, H, 3H)
        "wo": jnp.stack(wo_l).astype(bf16),                          # (L, H, H)
        "w1": jnp.stack(w1_l).astype(bf16),                          # (L, H, FFN)
        "w2": jnp.stack(w2_l).astype(bf16),                          # (L, FFN, H)
        "whead": whead,                                              # (2, H, H)
    }


# --------------------------------- forward ----------------------------------
@jax.jit
def model_forward(inputs, packed, tok_emb):
    ids = inputs["input_ids"]                                        # (B, S) int32
    emb = jnp.take(tok_emb, ids.reshape(-1), axis=0)                 # (B*S, H) glue gather
    mask = inputs["attention_mask"].astype(jnp.float32)              # (B, S)
    neg = jnp.repeat((mask - 1.0) * 1e9, NUM_HEADS, axis=0)[:, None, :]  # (B*nh, 1, S)
    out = fused_forward(emb, neg, packed)                            # (2B, H) single pallas_call
    pooled = out[:B, :]                                              # pooler output (B, H)
    probs = out[B:, :NUM_CLASSES]                                    # sigmoid logits (B, C)
    return pooled, probs


if __name__ == "__main__":
    key = jax.random.PRNGKey(0)
    k_param, k_ids = jax.random.split(key)
    params = init_params(k_param)
    packed = pack_params(params)

    inputs = {
        "input_ids": jax.random.randint(k_ids, (B, S), 0, VOCAB, dtype=jnp.int32),
        "attention_mask": jnp.ones((B, S), jnp.int32),
    }

    pooled, probs = model_forward(inputs, packed, params["tok_emb"])
    jax.block_until_ready((pooled, probs))

    # mimic the PyTorch return: python lists of the first batch element
    result = {
        "out": jax.device_get(probs)[0].tolist(),
        "language_model": jax.device_get(pooled)[0].tolist(),
    }
    assert len(result["out"]) == NUM_CLASSES
    assert len(result["language_model"]) == H
    assert all(0.0 <= v <= 1.0 for v in result["out"])
    print("KERNEL_OK")
</pallas_src>

<mosaic_0001>
module attributes {stable_mosaic.version = 11 : i64} {
  func.func @fused_forward_kernel(%arg0: i32, %arg1: memref<16x32xf32, #tpu.memory_space<vmem>>, %arg2: memref<8x1x8xf32, #tpu.memory_space<vmem>>, %arg3: memref<20x32xf32, #tpu.memory_space<vmem>>, %arg4: memref<2x8x96xf32, #tpu.memory_space<vmem>>, %arg5: memref<2x32x96xbf16, #tpu.memory_space<vmem>>, %arg6: memref<2x32x32xbf16, #tpu.memory_space<vmem>>, %arg7: memref<2x32x64xbf16, #tpu.memory_space<vmem>>, %arg8: memref<2x64x32xbf16, #tpu.memory_space<vmem>>, %arg9: memref<2x32x32xbf16, #tpu.memory_space<vmem>>, %arg10: memref<4x32xf32, #tpu.memory_space<vmem>>) attributes {dimension_semantics = [#tpu.dimension_semantics<arbitrary>], iteration_bounds = array<i64: 1>, scalar_prefetch = 0 : i64, scratch_operands = 0 : i64, tpu.core_type = #tpu.core_type<tc>, window_params = [{pipeline_mode = #tpu.pipeline_mode<synchronous>, transform_indices = @transform_0, window_bounds = array<i64: 16, 32>}, {pipeline_mode = #tpu.pipeline_mode<synchronous>, transform_indices = @transform_1, window_bounds = array<i64: 8, 1, 8>}, {pipeline_mode = #tpu.pipeline_mode<synchronous>, transform_indices = @transform_2, window_bounds = array<i64: 20, 32>}, {pipeline_mode = #tpu.pipeline_mode<synchronous>, transform_indices = @transform_3, window_bounds = array<i64: 2, 8, 96>}, {pipeline_mode = #tpu.pipeline_mode<synchronous>, transform_indices = @transform_4, window_bounds = array<i64: 2, 32, 96>}, {pipeline_mode = #tpu.pipeline_mode<synchronous>, transform_indices = @transform_5, window_bounds = array<i64: 2, 32, 32>}, {pipeline_mode = #tpu.pipeline_mode<synchronous>, transform_indices = @transform_6, window_bounds = array<i64: 2, 32, 64>}, {pipeline_mode = #tpu.pipeline_mode<synchronous>, transform_indices = @transform_7, window_bounds = array<i64: 2, 64, 32>}, {pipeline_mode = #tpu.pipeline_mode<synchronous>, transform_indices = @transform_8, window_bounds = array<i64: 2, 32, 32>}, {pipeline_mode = #tpu.pipeline_mode<synchronous>, transform_indices = @transform_9, window_bounds = array<i64: 4, 32>}]} {
    %c0 = arith.constant 0 : index
    %c0_0 = arith.constant 0 : index
    %c0_1 = arith.constant 0 : index
    %0 = vector.load %arg2[%c0, %c0_0, %c0_1] : memref<8x1x8xf32, #tpu.memory_space<vmem>>, vector<8x1x8xf32>
    %c0_2 = arith.constant 0 : index
    %c0_3 = arith.constant 0 : index
    %1 = vector.load %arg1[%c0_2, %c0_3] : memref<16x32xf32, #tpu.memory_space<vmem>>, vector<16x32xf32>
    %c0_4 = arith.constant 0 : index
    %c0_5 = arith.constant 0 : index
    %2 = vector.load %arg3[%c0_4, %c0_5] : memref<20x32xf32, #tpu.memory_space<vmem>>, vector<16x32xf32>
    %3 = arith.addf %1, %2 : vector<16x32xf32>
    %c16 = arith.constant 16 : index
    %c0_6 = arith.constant 0 : index
    %4 = vector.load %arg3[%c16, %c0_6] : memref<20x32xf32, #tpu.memory_space<vmem>>, vector<1x32xf32>
    %c17 = arith.constant 17 : index
    %c0_7 = arith.constant 0 : index
    %5 = vector.load %arg3[%c17, %c0_7] : memref<20x32xf32, #tpu.memory_space<vmem>>, vector<1x32xf32>
    %cst = arith.constant dense<0.000000e+00> : vector<16xf32>
    %6 = vector.multi_reduction <add>, %3, %cst [1] : vector<16x32xf32> to vector<16xf32>
    %7 = vector.shape_cast %6 : vector<16xf32> to vector<16x1xf32>
    %cst_8 = arith.constant 3.200000e+01 : f32
    %8 = vector.broadcast %cst_8 : f32 to vector<16x1xf32>
    %9 = arith.divf %7, %8 : vector<16x1xf32>
    %10 = arith.mulf %3, %3 : vector<16x32xf32>
    %cst_9 = arith.constant dense<0.000000e+00> : vector<16xf32>
    %11 = vector.multi_reduction <add>, %10, %cst_9 [1] : vector<16x32xf32> to vector<16xf32>
    %12 = vector.shape_cast %11 : vector<16xf32> to vector<16x1xf32>
    %cst_10 = arith.constant 3.200000e+01 : f32
    %13 = vector.broadcast %cst_10 : f32 to vector<16x1xf32>
    %14 = arith.divf %12, %13 : vector<16x1xf32>
    %15 = arith.mulf %9, %9 : vector<16x1xf32>
    %16 = arith.subf %14, %15 : vector<16x1xf32>
    %17 = vector.broadcast %9 : vector<16x1xf32> to vector<16x32xf32>
    %18 = arith.subf %3, %17 : vector<16x32xf32>
    %cst_11 = arith.constant 9.99999974E-6 : f32
    %19 = vector.broadcast %cst_11 : f32 to vector<16x1xf32>
    %20 = arith.addf %16, %19 : vector<16x1xf32>
    %21 = math.rsqrt %20 : vector<16x1xf32>
    %22 = vector.broadcast %21 : vector<16x1xf32> to vector<16x32xf32>
    %23 = arith.mulf %18, %22 : vector<16x32xf32>
    %24 = vector.broadcast %4 : vector<1x32xf32> to vector<16x32xf32>
    %25 = arith.mulf %23, %24 : vector<16x32xf32>
    %26 = vector.broadcast %5 : vector<1x32xf32> to vector<16x32xf32>
    %27 = arith.addf %25, %26 : vector<16x32xf32>
    %c0_12 = arith.constant 0 : index
    %c0_13 = arith.constant 0 : index
    %c0_14 = arith.constant 0 : index
    %28 = vector.load %arg4[%c0_12, %c0_13, %c0_14] : memref<2x8x96xf32, #tpu.memory_space<vmem>>, vector<1x8x96xf32>
    %29 = vector.shape_cast %28 : vector<1x8x96xf32> to vector<8x96xf32>
    %30 = vector.extract_strided_slice %29 {offsets = [0, 0], sizes = [1, 96], strides = [1, 1]} : vector<8x96xf32> to vector<1x96xf32>
    %31 = vector.extract_strided_slice %29 {offsets = [1, 0], sizes = [1, 32], strides = [1, 1]} : vector<8x96xf32> to vector<1x32xf32>
    %32 = vector.extract_strided_slice %29 {offsets = [2, 0], sizes = [1, 32], strides = [1, 1]} : vector<8x96xf32> to vector<1x32xf32>
    %33 = vector.extract_strided_slice %29 {offsets = [3, 0], sizes = [1, 32], strides = [1, 1]} : vector<8x96xf32> to vector<1x32xf32>
    %34 = vector.extract_strided_slice %29 {offsets = [4, 0], sizes = [1, 64], strides = [1, 1]} : vector<8x96xf32> to vector<1x64xf32>
    %35 = vector.extract_strided_slice %29 {offsets = [5, 0], sizes = [1, 32], strides = [1, 1]} : vector<8x96xf32> to vector<1x32xf32>
    %36 = vector.extract_strided_slice %29 {offsets = [6, 0], sizes = [1, 32], strides = [1, 1]} : vector<8x96xf32> to vector<1x32xf32>
    %37 = vector.extract_strided_slice %29 {offsets = [7, 0], sizes = [1, 32], strides = [1, 1]} : vector<8x96xf32> to vector<1x32xf32>
    %38 = arith.truncf %27 : vector<16x32xf32> to vector<16x32xbf16>
    %c0_15 = arith.constant 0 : index
    %c0_16 = arith.constant 0 : index
    %c0_17 = arith.constant 0 : index
    %39 = vector.load %arg5[%c0_15, %c0_16, %c0_17] : memref<2x32x96xbf16, #tpu.memory_space<vmem>>, vector<1x32x96xbf16>
    %40 = vector.shape_cast %39 : vector<1x32x96xbf16> to vector<32x96xbf16>
    %cst_18 = arith.constant dense<0.000000e+00> : vector<16x96xf32>
    %41 = tpu.matmul %38, %40, %cst_18 {dimension_numbers = #tpu.dot_dimension_numbers<[1], [0], [0], [1], [0, 0, 1, 1], [], []>} : vector<16x32xbf16>, vector<32x96xbf16>, vector<16x96xf32> -> vector<16x96xf32>
    %42 = vector.broadcast %30 : vector<1x96xf32> to vector<16x96xf32>
    %43 = arith.addf %41, %42 : vector<16x96xf32>
    %44 = vector.extract_strided_slice %43 {offsets = [0, 0], sizes = [8, 96], strides = [1, 1]} : vector<16x96xf32> to vector<8x96xf32>
    %45 = vector.extract_strided_slice %44 {offsets = [0, 0], sizes = [8, 8], strides = [1, 1]} : vector<8x96xf32> to vector<8x8xf32>
    %46 = vector.extract_strided_slice %44 {offsets = [0, 32], sizes = [8, 8], strides = [1, 1]} : vector<8x96xf32> to vector<8x8xf32>
    %47 = vector.extract_strided_slice %44 {offsets = [0, 64], sizes = [8, 8], strides = [1, 1]} : vector<8x96xf32> to vector<8x8xf32>
    %48 = vector.extract_strided_slice %44 {offsets = [0, 8], sizes = [8, 8], strides = [1, 1]} : vector<8x96xf32> to vector<8x8xf32>
    %49 = vector.extract_strided_slice %44 {offsets = [0, 40], sizes = [8, 8], strides = [1, 1]} : vector<8x96xf32> to vector<8x8xf32>
    %50 = vector.extract_strided_slice %44 {offsets = [0, 72], sizes = [8, 8], strides = [1, 1]} : vector<8x96xf32> to vector<8x8xf32>
    %51 = vector.extract_strided_slice %44 {offsets = [0, 16], sizes = [8, 8], strides = [1, 1]} : vector<8x96xf32> to vector<8x8xf32>
    %52 = vector.extract_strided_slice %44 {offsets = [0, 48], sizes = [8, 8], strides = [1, 1]} : vector<8x96xf32> to vector<8x8xf32>
    %53 = vector.extract_strided_slice %44 {offsets = [0, 80], sizes = [8, 8], strides = [1, 1]} : vector<8x96xf32> to vector<8x8xf32>
    %54 = vector.extract_strided_slice %44 {offsets = [0, 24], sizes = [8, 8], strides = [1, 1]} : vector<8x96xf32> to vector<8x8xf32>
    %55 = vector.extract_strided_slice %44 {offsets = [0, 56], sizes = [8, 8], strides = [1, 1]} : vector<8x96xf32> to vector<8x8xf32>
    %56 = vector.extract_strided_slice %44 {offsets = [0, 88], sizes = [8, 8], strides = [1, 1]} : vector<8x96xf32> to vector<8x8xf32>
    %57 = vector.extract_strided_slice %43 {offsets = [8, 0], sizes = [8, 96], strides = [1, 1]} : vector<16x96xf32> to vector<8x96xf32>
    %58 = vector.extract_strided_slice %57 {offsets = [0, 0], sizes = [8, 8], strides = [1, 1]} : vector<8x96xf32> to vector<8x8xf32>
    %59 = vector.extract_strided_slice %57 {offsets = [0, 32], sizes = [8, 8], strides = [1, 1]} : vector<8x96xf32> to vector<8x8xf32>
    %60 = vector.extract_strided_slice %57 {offsets = [0, 64], sizes = [8, 8], strides = [1, 1]} : vector<8x96xf32> to vector<8x8xf32>
    %61 = vector.extract_strided_slice %57 {offsets = [0, 8], sizes = [8, 8], strides = [1, 1]} : vector<8x96xf32> to vector<8x8xf32>
    %62 = vector.extract_strided_slice %57 {offsets = [0, 40], sizes = [8, 8], strides = [1, 1]} : vector<8x96xf32> to vector<8x8xf32>
    %63 = vector.extract_strided_slice %57 {offsets = [0, 72], sizes = [8, 8], strides = [1, 1]} : vector<8x96xf32> to vector<8x8xf32>
    %64 = vector.extract_strided_slice %57 {offsets = [0, 16], sizes = [8, 8], strides = [1, 1]} : vector<8x96xf32> to vector<8x8xf32>
    %65 = vector.extract_strided_slice %57 {offsets = [0, 48], sizes = [8, 8], strides = [1, 1]} : vector<8x96xf32> to vector<8x8xf32>
    %66 = vector.extract_strided_slice %57 {offsets = [0, 80], sizes = [8, 8], strides = [1, 1]} : vector<8x96xf32> to vector<8x8xf32>
    %67 = vector.extract_strided_slice %57 {offsets = [0, 24], sizes = [8, 8], strides = [1, 1]} : vector<8x96xf32> to vector<8x8xf32>
    %68 = vector.extract_strided_slice %57 {offsets = [0, 56], sizes = [8, 8], strides = [1, 1]} : vector<8x96xf32> to vector<8x8xf32>
    %69 = vector.extract_strided_slice %57 {offsets = [0, 88], sizes = [8, 8], strides = [1, 1]} : vector<8x96xf32> to vector<8x8xf32>
    %70 = vector.shape_cast %45 : vector<8x8xf32> to vector<1x8x8xf32>
    %71 = vector.shape_cast %48 : vector<8x8xf32> to vector<1x8x8xf32>
    %72 = vector.shape_cast %51 : vector<8x8xf32> to vector<1x8x8xf32>
    %73 = vector.shape_cast %54 : vector<8x8xf32> to vector<1x8x8xf32>
    %74 = vector.shape_cast %58 : vector<8x8xf32> to vector<1x8x8xf32>
    %75 = vector.shape_cast %61 : vector<8x8xf32> to vector<1x8x8xf32>
    %76 = vector.shape_cast %64 : vector<8x8xf32> to vector<1x8x8xf32>
    %77 = vector.shape_cast %67 : vector<8x8xf32> to vector<1x8x8xf32>
    %78 = tpu.concatenate %70, %71, %72, %73, %74, %75, %76, %77 in 0 : vector<1x8x8xf32>, vector<1x8x8xf32>, vector<1x8x8xf32>, vector<1x8x8xf32>, vector<1x8x8xf32>, vector<1x8x8xf32>, vector<1x8x8xf32>, vector<1x8x8xf32> -> vector<8x8x8xf32>
    %79 = arith.truncf %78 : vector<8x8x8xf32> to vector<8x8x8xbf16>
    %80 = vector.shape_cast %46 : vector<8x8xf32> to vector<1x8x8xf32>
    %81 = vector.shape_cast %49 : vector<8x8xf32> to vector<1x8x8xf32>
    %82 = vector.shape_cast %52 : vector<8x8xf32> to vector<1x8x8xf32>
    %83 = vector.shape_cast %55 : vector<8x8xf32> to vector<1x8x8xf32>
    %84 = vector.shape_cast %59 : vector<8x8xf32> to vector<1x8x8xf32>
    %85 = vector.shape_cast %62 : vector<8x8xf32> to vector<1x8x8xf32>
    %86 = vector.shape_cast %65 : vector<8x8xf32> to vector<1x8x8xf32>
    %87 = vector.shape_cast %68 : vector<8x8xf32> to vector<1x8x8xf32>
    %88 = tpu.concatenate %80, %81, %82, %83, %84, %85, %86, %87 in 0 : vector<1x8x8xf32>, vector<1x8x8xf32>, vector<1x8x8xf32>, vector<1x8x8xf32>, vector<1x8x8xf32>, vector<1x8x8xf32>, vector<1x8x8xf32>, vector<1x8x8xf32> -> vector<8x8x8xf32>
    %89 = arith.truncf %88 : vector<8x8x8xf32> to vector<8x8x8xbf16>
    %90 = vector.shape_cast %47 : vector<8x8xf32> to vector<1x8x8xf32>
    %91 = vector.shape_cast %50 : vector<8x8xf32> to vector<1x8x8xf32>
    %92 = vector.shape_cast %53 : vector<8x8xf32> to vector<1x8x8xf32>
    %93 = vector.shape_cast %56 : vector<8x8xf32> to vector<1x8x8xf32>
    %94 = vector.shape_cast %60 : vector<8x8xf32> to vector<1x8x8xf32>
    %95 = vector.shape_cast %63 : vector<8x8xf32> to vector<1x8x8xf32>
    %96 = vector.shape_cast %66 : vector<8x8xf32> to vector<1x8x8xf32>
    %97 = vector.shape_cast %69 : vector<8x8xf32> to vector<1x8x8xf32>
    %98 = tpu.concatenate %90, %91, %92, %93, %94, %95, %96, %97 in 0 : vector<1x8x8xf32>, vector<1x8x8xf32>, vector<1x8x8xf32>, vector<1x8x8xf32>, vector<1x8x8xf32>, vector<1x8x8xf32>, vector<1x8x8xf32>, vector<1x8x8xf32> -> vector<8x8x8xf32>
    %99 = arith.truncf %98 : vector<8x8x8xf32> to vector<8x8x8xbf16>
    "tpu.trace_start"() <{level = 10 : i32, message = "hqd,hkd->hqk"}> : () -> ()
    %cst_19 = arith.constant dense<0.000000e+00> : vector<8x8x8xf32>
    %100 = tpu.matmul %79, %89, %cst_19 {dimension_numbers = #tpu.dot_dimension_numbers<[2], [2], [1], [1], [0, 0, 0, 1, 1, 1], [0], [0]>} : vector<8x8x8xbf16>, vector<8x8x8xbf16>, vector<8x8x8xf32> -> vector<8x8x8xf32>
    "tpu.trace_stop"() : () -> ()
    %101 = vector.broadcast %0 : vector<8x1x8xf32> to vector<8x8x8xf32>
    %102 = arith.addf %100, %101 : vector<8x8x8xf32>
    %cst_20 = arith.constant dense<0xFF800000> : vector<8x8xf32>
    %103 = vector.multi_reduction <maximumf>, %102, %cst_20 [2] : vector<8x8x8xf32> to vector<8x8xf32>
    %104 = vector.shape_cast %103 : vector<8x8xf32> to vector<8x8x1xf32>
    %105 = vector.broadcast %104 : vector<8x8x1xf32> to vector<8x8x8xf32>
    %106 = arith.subf %102, %105 : vector<8x8x8xf32>
    %107 = math.exp %106 : vector<8x8x8xf32>
    %cst_21 = arith.constant dense<0.000000e+00> : vector<8x8xf32>
    %108 = vector.multi_reduction <add>, %107, %cst_21 [2] : vector<8x8x8xf32> to vector<8x8xf32>
    %109 = vector.shape_cast %108 : vector<8x8xf32> to vector<8x8x1xf32>
    %110 = tpu.reciprocal %109 {approx = true} : vector<8x8x1xf32> -> vector<8x8x1xf32>
    %111 = vector.broadcast %110 : vector<8x8x1xf32> to vector<8x8x8xf32>
    %112 = arith.mulf %107, %111 : vector<8x8x8xf32>
    %113 = arith.truncf %112 : vector<8x8x8xf32> to vector<8x8x8xbf16>
    "tpu.trace_start"() <{level = 10 : i32, message = "hqk,hkd->hqd"}> : () -> ()
    %cst_22 = arith.constant dense<0.000000e+00> : vector<8x8x8xf32>
    %114 = tpu.matmul %113, %99, %cst_22 {dimension_numbers = #tpu.dot_dimension_numbers<[2], [1], [1], [2], [0, 0, 0, 1, 1, 2], [0], [0]>} : vector<8x8x8xbf16>, vector<8x8x8xbf16>, vector<8x8x8xf32> -> vector<8x8x8xf32>
    "tpu.trace_stop"() : () -> ()
    %115 = vector.extract_strided_slice %114 {offsets = [0, 0, 0], sizes = [1, 8, 8], strides = [1, 1, 1]} : vector<8x8x8xf32> to vector<1x8x8xf32>
    %116 = vector.shape_cast %115 : vector<1x8x8xf32> to vector<8x8xf32>
    %117 = vector.extract_strided_slice %114 {offsets = [1, 0, 0], sizes = [1, 8, 8], strides = [1, 1, 1]} : vector<8x8x8xf32> to vector<1x8x8xf32>
    %118 = vector.shape_cast %117 : vector<1x8x8xf32> to vector<8x8xf32>
    %119 = vector.extract_strided_slice %114 {offsets = [2, 0, 0], sizes = [1, 8, 8], strides = [1, 1, 1]} : vector<8x8x8xf32> to vector<1x8x8xf32>
    %120 = vector.shape_cast %119 : vector<1x8x8xf32> to vector<8x8xf32>
    %121 = vector.extract_strided_slice %114 {offsets = [3, 0, 0], sizes = [1, 8, 8], strides = [1, 1, 1]} : vector<8x8x8xf32> to vector<1x8x8xf32>
    %122 = vector.shape_cast %121 : vector<1x8x8xf32> to vector<8x8xf32>
    %123 = tpu.concatenate %116, %118, %120, %122 in 1 : vector<8x8xf32>, vector<8x8xf32>, vector<8x8xf32>, vector<8x8xf32> -> vector<8x32xf32>
    %124 = vector.extract_strided_slice %114 {offsets = [4, 0, 0], sizes = [1, 8, 8], strides = [1, 1, 1]} : vector<8x8x8xf32> to vector<1x8x8xf32>
    %125 = vector.shape_cast %124 : vector<1x8x8xf32> to vector<8x8xf32>
    %126 = vector.extract_strided_slice %114 {offsets = [5, 0, 0], sizes = [1, 8, 8], strides = [1, 1, 1]} : vector<8x8x8xf32> to vector<1x8x8xf32>
    %127 = vector.shape_cast %126 : vector<1x8x8xf32> to vector<8x8xf32>
    %128 = vector.extract_strided_slice %114 {offsets = [6, 0, 0], sizes = [1, 8, 8], strides = [1, 1, 1]} : vector<8x8x8xf32> to vector<1x8x8xf32>
    %129 = vector.shape_cast %128 : vector<1x8x8xf32> to vector<8x8xf32>
    %130 = vector.extract_strided_slice %114 {offsets = [7, 0, 0], sizes = [1, 8, 8], strides = [1, 1, 1]} : vector<8x8x8xf32> to vector<1x8x8xf32>
    %131 = vector.shape_cast %130 : vector<1x8x8xf32> to vector<8x8xf32>
    %132 = tpu.concatenate %125, %127, %129, %131 in 1 : vector<8x8xf32>, vector<8x8xf32>, vector<8x8xf32>, vector<8x8xf32> -> vector<8x32xf32>
    %133 = tpu.concatenate %123, %132 in 0 : vector<8x32xf32>, vector<8x32xf32> -> vector<16x32xf32>
    %134 = arith.truncf %133 : vector<16x32xf32> to vector<16x32xbf16>
    %c0_23 = arith.constant 0 : index
    %c0_24 = arith.constant 0 : index
    %c0_25 = arith.constant 0 : index
    %135 = vector.load %arg6[%c0_23, %c0_24, %c0_25] : memref<2x32x32xbf16, #tpu.memory_space<vmem>>, vector<1x32x32xbf16>
    %136 = vector.shape_cast %135 : vector<1x32x32xbf16> to vector<32x32xbf16>
    %cst_26 = arith.constant dense<0.000000e+00> : vector<16x32xf32>
    %137 = tpu.matmul %134, %136, %cst_26 {dimension_numbers = #tpu.dot_dimension_numbers<[1], [0], [0], [1], [0, 0, 1, 1], [], []>} : vector<16x32xbf16>, vector<32x32xbf16>, vector<16x32xf32> -> vector<16x32xf32>
    %138 = vector.broadcast %31 : vector<1x32xf32> to vector<16x32xf32>
    %139 = arith.addf %137, %138 : vector<16x32xf32>
    %140 = arith.addf %27, %139 : vector<16x32xf32>
    %cst_27 = arith.constant dense<0.000000e+00> : vector<16xf32>
    %141 = vector.multi_reduction <add>, %140, %cst_27 [1] : vector<16x32xf32> to vector<16xf32>
    %142 = vector.shape_cast %141 : vector<16xf32> to vector<16x1xf32>
    %cst_28 = arith.constant 3.200000e+01 : f32
    %143 = vector.broadcast %cst_28 : f32 to vector<16x1xf32>
    %144 = arith.divf %142, %143 : vector<16x1xf32>
    %145 = arith.mulf %140, %140 : vector<16x32xf32>
    %cst_29 = arith.constant dense<0.000000e+00> : vector<16xf32>
    %146 = vector.multi_reduction <add>, %145, %cst_29 [1] : vector<16x32xf32> to vector<16xf32>
    %147 = vector.shape_cast %146 : vector<16xf32> to vector<16x1xf32>
    %cst_30 = arith.constant 3.200000e+01 : f32
    %148 = vector.broadcast %cst_30 : f32 to vector<16x1xf32>
    %149 = arith.divf %147, %148 : vector<16x1xf32>
    %150 = arith.mulf %144, %144 : vector<16x1xf32>
    %151 = arith.subf %149, %150 : vector<16x1xf32>
    %152 = vector.broadcast %144 : vector<16x1xf32> to vector<16x32xf32>
    %153 = arith.subf %140, %152 : vector<16x32xf32>
    %cst_31 = arith.constant 9.99999974E-6 : f32
    %154 = vector.broadcast %cst_31 : f32 to vector<16x1xf32>
    %155 = arith.addf %151, %154 : vector<16x1xf32>
    %156 = math.rsqrt %155 : vector<16x1xf32>
    %157 = vector.broadcast %156 : vector<16x1xf32> to vector<16x32xf32>
    %158 = arith.mulf %153, %157 : vector<16x32xf32>
    %159 = vector.broadcast %32 : vector<1x32xf32> to vector<16x32xf32>
    %160 = arith.mulf %158, %159 : vector<16x32xf32>
    %161 = vector.broadcast %33 : vector<1x32xf32> to vector<16x32xf32>
    %162 = arith.addf %160, %161 : vector<16x32xf32>
    %163 = arith.truncf %162 : vector<16x32xf32> to vector<16x32xbf16>
    %c0_32 = arith.constant 0 : index
    %c0_33 = arith.constant 0 : index
    %c0_34 = arith.constant 0 : index
    %164 = vector.load %arg7[%c0_32, %c0_33, %c0_34] : memref<2x32x64xbf16, #tpu.memory_space<vmem>>, vector<1x32x64xbf16>
    %165 = vector.shape_cast %164 : vector<1x32x64xbf16> to vector<32x64xbf16>
    %cst_35 = arith.constant dense<0.000000e+00> : vector<16x64xf32>
    %166 = tpu.matmul %163, %165, %cst_35 {dimension_numbers = #tpu.dot_dimension_numbers<[1], [0], [0], [1], [0, 0, 1, 1], [], []>} : vector<16x32xbf16>, vector<32x64xbf16>, vector<16x64xf32> -> vector<16x64xf32>
    %167 = vector.broadcast %34 : vector<1x64xf32> to vector<16x64xf32>
    %168 = arith.addf %166, %167 : vector<16x64xf32>
    %169 = arith.mulf %168, %168 : vector<16x64xf32>
    %170 = arith.mulf %168, %169 : vector<16x64xf32>
    %cst_36 = arith.constant 4.471500e-02 : f32
    %171 = vector.broadcast %cst_36 : f32 to vector<16x64xf32>
    %172 = arith.mulf %171, %170 : vector<16x64xf32>
    %173 = arith.addf %168, %172 : vector<16x64xf32>
    %cst_37 = arith.constant 0.797884583 : f32
    %174 = vector.broadcast %cst_37 : f32 to vector<16x64xf32>
    %175 = arith.mulf %174, %173 : vector<16x64xf32>
    %176 = math.tanh %175 : vector<16x64xf32>
    %cst_38 = arith.constant 1.000000e+00 : f32
    %177 = vector.broadcast %cst_38 : f32 to vector<16x64xf32>
    %178 = arith.addf %177, %176 : vector<16x64xf32>
    %cst_39 = arith.constant 5.000000e-01 : f32
    %179 = vector.broadcast %cst_39 : f32 to vector<16x64xf32>
    %180 = arith.mulf %179, %178 : vector<16x64xf32>
    %181 = arith.mulf %168, %180 : vector<16x64xf32>
    %182 = arith.truncf %181 : vector<16x64xf32> to vector<16x64xbf16>
    %c0_40 = arith.constant 0 : index
    %c0_41 = arith.constant 0 : index
    %c0_42 = arith.constant 0 : index
    %183 = vector.load %arg8[%c0_40, %c0_41, %c0_42] : memref<2x64x32xbf16, #tpu.memory_space<vmem>>, vector<1x64x32xbf16>
    %184 = vector.shape_cast %183 : vector<1x64x32xbf16> to vector<64x32xbf16>
    %cst_43 = arith.constant dense<0.000000e+00> : vector<16x32xf32>
    %185 = tpu.matmul %182, %184, %cst_43 {dimension_numbers = #tpu.dot_dimension_numbers<[1], [0], [0], [1], [0, 0, 1, 1], [], []>} : vector<16x64xbf16>, vector<64x32xbf16>, vector<16x32xf32> -> vector<16x32xf32>
    %186 = vector.broadcast %35 : vector<1x32xf32> to vector<16x32xf32>
    %187 = arith.addf %185, %186 : vector<16x32xf32>
    %188 = arith.addf %162, %187 : vector<16x32xf32>
    %cst_44 = arith.constant dense<0.000000e+00> : vector<16xf32>
    %189 = vector.multi_reduction <add>, %188, %cst_44 [1] : vector<16x32xf32> to vector<16xf32>
    %190 = vector.shape_cast %189 : vector<16xf32> to vector<16x1xf32>
    %cst_45 = arith.constant 3.200000e+01 : f32
    %191 = vector.broadcast %cst_45 : f32 to vector<16x1xf32>
    %192 = arith.divf %190, %191 : vector<16x1xf32>
    %193 = arith.mulf %188, %188 : vector<16x32xf32>
    %cst_46 = arith.constant dense<0.000000e+00> : vector<16xf32>
    %194 = vector.multi_reduction <add>, %193, %cst_46 [1] : vector<16x32xf32> to vector<16xf32>
    %195 = vector.shape_cast %194 : vector<16xf32> to vector<16x1xf32>
    %cst_47 = arith.constant 3.200000e+01 : f32
    %196 = vector.broadcast %cst_47 : f32 to vector<16x1xf32>
    %197 = arith.divf %195, %196 : vector<16x1xf32>
    %198 = arith.mulf %192, %192 : vector<16x1xf32>
    %199 = arith.subf %197, %198 : vector<16x1xf32>
    %200 = vector.broadcast %192 : vector<16x1xf32> to vector<16x32xf32>
    %201 = arith.subf %188, %200 : vector<16x32xf32>
    %cst_48 = arith.constant 9.99999974E-6 : f32
    %202 = vector.broadcast %cst_48 : f32 to vector<16x1xf32>
    %203 = arith.addf %199, %202 : vector<16x1xf32>
    %204 = math.rsqrt %203 : vector<16x1xf32>
    %205 = vector.broadcast %204 : vector<16x1xf32> to vector<16x32xf32>
    %206 = arith.mulf %201, %205 : vector<16x32xf32>
    %207 = vector.broadcast %36 : vector<1x32xf32> to vector<16x32xf32>
    %208 = arith.mulf %206, %207 : vector<16x32xf32>
    %209 = vector.broadcast %37 : vector<1x32xf32> to vector<16x32xf32>
    %210 = arith.addf %208, %209 : vector<16x32xf32>
    %c1 = arith.constant 1 : index
    %c0_49 = arith.constant 0 : index
    %c0_50 = arith.constant 0 : index
    %211 = vector.load %arg4[%c1, %c0_49, %c0_50] : memref<2x8x96xf32, #tpu.memory_space<vmem>>, vector<1x8x96xf32>
    %212 = vector.shape_cast %211 : vector<1x8x96xf32> to vector<8x96xf32>
    %213 = vector.extract_strided_slice %212 {offsets = [0, 0], sizes = [1, 96], strides = [1, 1]} : vector<8x96xf32> to vector<1x96xf32>
    %214 = vector.extract_strided_slice %212 {offsets = [1, 0], sizes = [1, 32], strides = [1, 1]} : vector<8x96xf32> to vector<1x32xf32>
    %215 = vector.extract_strided_slice %212 {offsets = [2, 0], sizes = [1, 32], strides = [1, 1]} : vector<8x96xf32> to vector<1x32xf32>
    %216 = vector.extract_strided_slice %212 {offsets = [3, 0], sizes = [1, 32], strides = [1, 1]} : vector<8x96xf32> to vector<1x32xf32>
    %217 = vector.extract_strided_slice %212 {offsets = [4, 0], sizes = [1, 64], strides = [1, 1]} : vector<8x96xf32> to vector<1x64xf32>
    %218 = vector.extract_strided_slice %212 {offsets = [5, 0], sizes = [1, 32], strides = [1, 1]} : vector<8x96xf32> to vector<1x32xf32>
    %219 = vector.extract_strided_slice %212 {offsets = [6, 0], sizes = [1, 32], strides = [1, 1]} : vector<8x96xf32> to vector<1x32xf32>
    %220 = vector.extract_strided_slice %212 {offsets = [7, 0], sizes = [1, 32], strides = [1, 1]} : vector<8x96xf32> to vector<1x32xf32>
    %221 = arith.truncf %210 : vector<16x32xf32> to vector<16x32xbf16>
    %c1_51 = arith.constant 1 : index
    %c0_52 = arith.constant 0 : index
    %c0_53 = arith.constant 0 : index
    %222 = vector.load %arg5[%c1_51, %c0_52, %c0_53] : memref<2x32x96xbf16, #tpu.memory_space<vmem>>, vector<1x32x96xbf16>
    %223 = vector.shape_cast %222 : vector<1x32x96xbf16> to vector<32x96xbf16>
    %cst_54 = arith.constant dense<0.000000e+00> : vector<16x96xf32>
    %224 = tpu.matmul %221, %223, %cst_54 {dimension_numbers = #tpu.dot_dimension_numbers<[1], [0], [0], [1], [0, 0, 1, 1], [], []>} : vector<16x32xbf16>, vector<32x96xbf16>, vector<16x96xf32> -> vector<16x96xf32>
    %225 = vector.broadcast %213 : vector<1x96xf32> to vector<16x96xf32>
    %226 = arith.addf %224, %225 : vector<16x96xf32>
    %227 = vector.extract_strided_slice %226 {offsets = [0, 0], sizes = [8, 96], strides = [1, 1]} : vector<16x96xf32> to vector<8x96xf32>
    %228 = vector.extract_strided_slice %227 {offsets = [0, 0], sizes = [8, 8], strides = [1, 1]} : vector<8x96xf32> to vector<8x8xf32>
    %229 = vector.extract_strided_slice %227 {offsets = [0, 32], sizes = [8, 8], strides = [1, 1]} : vector<8x96xf32> to vector<8x8xf32>
    %230 = vector.extract_strided_slice %227 {offsets = [0, 64], sizes = [8, 8], strides = [1, 1]} : vector<8x96xf32> to vector<8x8xf32>
    %231 = vector.extract_strided_slice %227 {offsets = [0, 8], sizes = [8, 8], strides = [1, 1]} : vector<8x96xf32> to vector<8x8xf32>
    %232 = vector.extract_strided_slice %227 {offsets = [0, 40], sizes = [8, 8], strides = [1, 1]} : vector<8x96xf32> to vector<8x8xf32>
    %233 = vector.extract_strided_slice %227 {offsets = [0, 72], sizes = [8, 8], strides = [1, 1]} : vector<8x96xf32> to vector<8x8xf32>
    %234 = vector.extract_strided_slice %227 {offsets = [0, 16], sizes = [8, 8], strides = [1, 1]} : vector<8x96xf32> to vector<8x8xf32>
    %235 = vector.extract_strided_slice %227 {offsets = [0, 48], sizes = [8, 8], strides = [1, 1]} : vector<8x96xf32> to vector<8x8xf32>
    %236 = vector.extract_strided_slice %227 {offsets = [0, 80], sizes = [8, 8], strides = [1, 1]} : vector<8x96xf32> to vector<8x8xf32>
    %237 = vector.extract_strided_slice %227 {offsets = [0, 24], sizes = [8, 8], strides = [1, 1]} : vector<8x96xf32> to vector<8x8xf32>
    %238 = vector.extract_strided_slice %227 {offsets = [0, 56], sizes = [8, 8], strides = [1, 1]} : vector<8x96xf32> to vector<8x8xf32>
    %239 = vector.extract_strided_slice %227 {offsets = [0, 88], sizes = [8, 8], strides = [1, 1]} : vector<8x96xf32> to vector<8x8xf32>
    %240 = vector.extract_strided_slice %226 {offsets = [8, 0], sizes = [8, 96], strides = [1, 1]} : vector<16x96xf32> to vector<8x96xf32>
    %241 = vector.extract_strided_slice %240 {offsets = [0, 0], sizes = [8, 8], strides = [1, 1]} : vector<8x96xf32> to vector<8x8xf32>
    %242 = vector.extract_strided_slice %240 {offsets = [0, 32], sizes = [8, 8], strides = [1, 1]} : vector<8x96xf32> to vector<8x8xf32>
    %243 = vector.extract_strided_slice %240 {offsets = [0, 64], sizes = [8, 8], strides = [1, 1]} : vector<8x96xf32> to vector<8x8xf32>
    %244 = vector.extract_strided_slice %240 {offsets = [0, 8], sizes = [8, 8], strides = [1, 1]} : vector<8x96xf32> to vector<8x8xf32>
    %245 = vector.extract_strided_slice %240 {offsets = [0, 40], sizes = [8, 8], strides = [1, 1]} : vector<8x96xf32> to vector<8x8xf32>
    %246 = vector.extract_strided_slice %240 {offsets = [0, 72], sizes = [8, 8], strides = [1, 1]} : vector<8x96xf32> to vector<8x8xf32>
    %247 = vector.extract_strided_slice %240 {offsets = [0, 16], sizes = [8, 8], strides = [1, 1]} : vector<8x96xf32> to vector<8x8xf32>
    %248 = vector.extract_strided_slice %240 {offsets = [0, 48], sizes = [8, 8], strides = [1, 1]} : vector<8x96xf32> to vector<8x8xf32>
    %249 = vector.extract_strided_slice %240 {offsets = [0, 80], sizes = [8, 8], strides = [1, 1]} : vector<8x96xf32> to vector<8x8xf32>
    %250 = vector.extract_strided_slice %240 {offsets = [0, 24], sizes = [8, 8], strides = [1, 1]} : vector<8x96xf32> to vector<8x8xf32>
    %251 = vector.extract_strided_slice %240 {offsets = [0, 56], sizes = [8, 8], strides = [1, 1]} : vector<8x96xf32> to vector<8x8xf32>
    %252 = vector.extract_strided_slice %240 {offsets = [0, 88], sizes = [8, 8], strides = [1, 1]} : vector<8x96xf32> to vector<8x8xf32>
    %253 = vector.shape_cast %228 : vector<8x8xf32> to vector<1x8x8xf32>
    %254 = vector.shape_cast %231 : vector<8x8xf32> to vector<1x8x8xf32>
    %255 = vector.shape_cast %234 : vector<8x8xf32> to vector<1x8x8xf32>
    %256 = vector.shape_cast %237 : vector<8x8xf32> to vector<1x8x8xf32>
    %257 = vector.shape_cast %241 : vector<8x8xf32> to vector<1x8x8xf32>
    %258 = vector.shape_cast %244 : vector<8x8xf32> to vector<1x8x8xf32>
    %259 = vector.shape_cast %247 : vector<8x8xf32> to vector<1x8x8xf32>
    %260 = vector.shape_cast %250 : vector<8x8xf32> to vector<1x8x8xf32>
    %261 = tpu.concatenate %253, %254, %255, %256, %257, %258, %259, %260 in 0 : vector<1x8x8xf32>, vector<1x8x8xf32>, vector<1x8x8xf32>, vector<1x8x8xf32>, vector<1x8x8xf32>, vector<1x8x8xf32>, vector<1x8x8xf32>, vector<1x8x8xf32> -> vector<8x8x8xf32>
    %262 = arith.truncf %261 : vector<8x8x8xf32> to vector<8x8x8xbf16>
    %263 = vector.shape_cast %229 : vector<8x8xf32> to vector<1x8x8xf32>
    %264 = vector.shape_cast %232 : vector<8x8xf32> to vector<1x8x8xf32>
    %265 = vector.shape_cast %235 : vector<8x8xf32> to vector<1x8x8xf32>
    %266 = vector.shape_cast %238 : vector<8x8xf32> to vector<1x8x8xf32>
    %267 = vector.shape_cast %242 : vector<8x8xf32> to vector<1x8x8xf32>
    %268 = vector.shape_cast %245 : vector<8x8xf32> to vector<1x8x8xf32>
    %269 = vector.shape_cast %248 : vector<8x8xf32> to vector<1x8x8xf32>
    %270 = vector.shape_cast %251 : vector<8x8xf32> to vector<1x8x8xf32>
    %271 = tpu.concatenate %263, %264, %265, %266, %267, %268, %269, %270 in 0 : vector<1x8x8xf32>, vector<1x8x8xf32>, vector<1x8x8xf32>, vector<1x8x8xf32>, vector<1x8x8xf32>, vector<1x8x8xf32>, vector<1x8x8xf32>, vector<1x8x8xf32> -> vector<8x8x8xf32>
    %272 = arith.truncf %271 : vector<8x8x8xf32> to vector<8x8x8xbf16>
    %273 = vector.shape_cast %230 : vector<8x8xf32> to vector<1x8x8xf32>
    %274 = vector.shape_cast %233 : vector<8x8xf32> to vector<1x8x8xf32>
    %275 = vector.shape_cast %236 : vector<8x8xf32> to vector<1x8x8xf32>
    %276 = vector.shape_cast %239 : vector<8x8xf32> to vector<1x8x8xf32>
    %277 = vector.shape_cast %243 : vector<8x8xf32> to vector<1x8x8xf32>
    %278 = vector.shape_cast %246 : vector<8x8xf32> to vector<1x8x8xf32>
    %279 = vector.shape_cast %249 : vector<8x8xf32> to vector<1x8x8xf32>
    %280 = vector.shape_cast %252 : vector<8x8xf32> to vector<1x8x8xf32>
    %281 = tpu.concatenate %273, %274, %275, %276, %277, %278, %279, %280 in 0 : vector<1x8x8xf32>, vector<1x8x8xf32>, vector<1x8x8xf32>, vector<1x8x8xf32>, vector<1x8x8xf32>, vector<1x8x8xf32>, vector<1x8x8xf32>, vector<1x8x8xf32> -> vector<8x8x8xf32>
    %282 = arith.truncf %281 : vector<8x8x8xf32> to vector<8x8x8xbf16>
    "tpu.trace_start"() <{level = 10 : i32, message = "hqd,hkd->hqk"}> : () -> ()
    %cst_55 = arith.constant dense<0.000000e+00> : vector<8x8x8xf32>
    %283 = tpu.matmul %262, %272, %cst_55 {dimension_numbers = #tpu.dot_dimension_numbers<[2], [2], [1], [1], [0, 0, 0, 1, 1, 1], [0], [0]>} : vector<8x8x8xbf16>, vector<8x8x8xbf16>, vector<8x8x8xf32> -> vector<8x8x8xf32>
    "tpu.trace_stop"() : () -> ()
    %284 = vector.broadcast %0 : vector<8x1x8xf32> to vector<8x8x8xf32>
    %285 = arith.addf %283, %284 : vector<8x8x8xf32>
    %cst_56 = arith.constant dense<0xFF800000> : vector<8x8xf32>
    %286 = vector.multi_reduction <maximumf>, %285, %cst_56 [2] : vector<8x8x8xf32> to vector<8x8xf32>
    %287 = vector.shape_cast %286 : vector<8x8xf32> to vector<8x8x1xf32>
    %288 = vector.broadcast %287 : vector<8x8x1xf32> to vector<8x8x8xf32>
    %289 = arith.subf %285, %288 : vector<8x8x8xf32>
    %290 = math.exp %289 : vector<8x8x8xf32>
    %cst_57 = arith.constant dense<0.000000e+00> : vector<8x8xf32>
    %291 = vector.multi_reduction <add>, %290, %cst_57 [2] : vector<8x8x8xf32> to vector<8x8xf32>
    %292 = vector.shape_cast %291 : vector<8x8xf32> to vector<8x8x1xf32>
    %293 = tpu.reciprocal %292 {approx = true} : vector<8x8x1xf32> -> vector<8x8x1xf32>
    %294 = vector.broadcast %293 : vector<8x8x1xf32> to vector<8x8x8xf32>
    %295 = arith.mulf %290, %294 : vector<8x8x8xf32>
    %296 = arith.truncf %295 : vector<8x8x8xf32> to vector<8x8x8xbf16>
    "tpu.trace_start"() <{level = 10 : i32, message = "hqk,hkd->hqd"}> : () -> ()
    %cst_58 = arith.constant dense<0.000000e+00> : vector<8x8x8xf32>
    %297 = tpu.matmul %296, %282, %cst_58 {dimension_numbers = #tpu.dot_dimension_numbers<[2], [1], [1], [2], [0, 0, 0, 1, 1, 2], [0], [0]>} : vector<8x8x8xbf16>, vector<8x8x8xbf16>, vector<8x8x8xf32> -> vector<8x8x8xf32>
    "tpu.trace_stop"() : () -> ()
    %298 = vector.extract_strided_slice %297 {offsets = [0, 0, 0], sizes = [1, 8, 8], strides = [1, 1, 1]} : vector<8x8x8xf32> to vector<1x8x8xf32>
    %299 = vector.shape_cast %298 : vector<1x8x8xf32> to vector<8x8xf32>
    %300 = vector.extract_strided_slice %297 {offsets = [1, 0, 0], sizes = [1, 8, 8], strides = [1, 1, 1]} : vector<8x8x8xf32> to vector<1x8x8xf32>
    %301 = vector.shape_cast %300 : vector<1x8x8xf32> to vector<8x8xf32>
    %302 = vector.extract_strided_slice %297 {offsets = [2, 0, 0], sizes = [1, 8, 8], strides = [1, 1, 1]} : vector<8x8x8xf32> to vector<1x8x8xf32>
    %303 = vector.shape_cast %302 : vector<1x8x8xf32> to vector<8x8xf32>
    %304 = vector.extract_strided_slice %297 {offsets = [3, 0, 0], sizes = [1, 8, 8], strides = [1, 1, 1]} : vector<8x8x8xf32> to vector<1x8x8xf32>
    %305 = vector.shape_cast %304 : vector<1x8x8xf32> to vector<8x8xf32>
    %306 = tpu.concatenate %299, %301, %303, %305 in 1 : vector<8x8xf32>, vector<8x8xf32>, vector<8x8xf32>, vector<8x8xf32> -> vector<8x32xf32>
    %307 = vector.extract_strided_slice %297 {offsets = [4, 0, 0], sizes = [1, 8, 8], strides = [1, 1, 1]} : vector<8x8x8xf32> to vector<1x8x8xf32>
    %308 = vector.shape_cast %307 : vector<1x8x8xf32> to vector<8x8xf32>
    %309 = vector.extract_strided_slice %297 {offsets = [5, 0, 0], sizes = [1, 8, 8], strides = [1, 1, 1]} : vector<8x8x8xf32> to vector<1x8x8xf32>
    %310 = vector.shape_cast %309 : vector<1x8x8xf32> to vector<8x8xf32>
    %311 = vector.extract_strided_slice %297 {offsets = [6, 0, 0], sizes = [1, 8, 8], strides = [1, 1, 1]} : vector<8x8x8xf32> to vector<1x8x8xf32>
    %312 = vector.shape_cast %311 : vector<1x8x8xf32> to vector<8x8xf32>
    %313 = vector.extract_strided_slice %297 {offsets = [7, 0, 0], sizes = [1, 8, 8], strides = [1, 1, 1]} : vector<8x8x8xf32> to vector<1x8x8xf32>
    %314 = vector.shape_cast %313 : vector<1x8x8xf32> to vector<8x8xf32>
    %315 = tpu.concatenate %308, %310, %312, %314 in 1 : vector<8x8xf32>, vector<8x8xf32>, vector<8x8xf32>, vector<8x8xf32> -> vector<8x32xf32>
    %316 = tpu.concatenate %306, %315 in 0 : vector<8x32xf32>, vector<8x32xf32> -> vector<16x32xf32>
    %317 = arith.truncf %316 : vector<16x32xf32> to vector<16x32xbf16>
    %c1_59 = arith.constant 1 : index
    %c0_60 = arith.constant 0 : index
    %c0_61 = arith.constant 0 : index
    %318 = vector.load %arg6[%c1_59, %c0_60, %c0_61] : memref<2x32x32xbf16, #tpu.memory_space<vmem>>, vector<1x32x32xbf16>
    %319 = vector.shape_cast %318 : vector<1x32x32xbf16> to vector<32x32xbf16>
    %cst_62 = arith.constant dense<0.000000e+00> : vector<16x32xf32>
    %320 = tpu.matmul %317, %319, %cst_62 {dimension_numbers = #tpu.dot_dimension_numbers<[1], [0], [0], [1], [0, 0, 1, 1], [], []>} : vector<16x32xbf16>, vector<32x32xbf16>, vector<16x32xf32> -> vector<16x32xf32>
    %321 = vector.broadcast %214 : vector<1x32xf32> to vector<16x32xf32>
    %322 = arith.addf %320, %321 : vector<16x32xf32>
    %323 = arith.addf %210, %322 : vector<16x32xf32>
    %cst_63 = arith.constant dense<0.000000e+00> : vector<16xf32>
    %324 = vector.multi_reduction <add>, %323, %cst_63 [1] : vector<16x32xf32> to vector<16xf32>
    %325 = vector.shape_cast %324 : vector<16xf32> to vector<16x1xf32>
    %cst_64 = arith.constant 3.200000e+01 : f32
    %326 = vector.broadcast %cst_64 : f32 to vector<16x1xf32>
    %327 = arith.divf %325, %326 : vector<16x1xf32>
    %328 = arith.mulf %323, %323 : vector<16x32xf32>
    %cst_65 = arith.constant dense<0.000000e+00> : vector<16xf32>
    %329 = vector.multi_reduction <add>, %328, %cst_65 [1] : vector<16x32xf32> to vector<16xf32>
    %330 = vector.shape_cast %329 : vector<16xf32> to vector<16x1xf32>
    %cst_66 = arith.constant 3.200000e+01 : f32
    %331 = vector.broadcast %cst_66 : f32 to vector<16x1xf32>
    %332 = arith.divf %330, %331 : vector<16x1xf32>
    %333 = arith.mulf %327, %327 : vector<16x1xf32>
    %334 = arith.subf %332, %333 : vector<16x1xf32>
    %335 = vector.broadcast %327 : vector<16x1xf32> to vector<16x32xf32>
    %336 = arith.subf %323, %335 : vector<16x32xf32>
    %cst_67 = arith.constant 9.99999974E-6 : f32
    %337 = vector.broadcast %cst_67 : f32 to vector<16x1xf32>
    %338 = arith.addf %334, %337 : vector<16x1xf32>
    %339 = math.rsqrt %338 : vector<16x1xf32>
    %340 = vector.broadcast %339 : vector<16x1xf32> to vector<16x32xf32>
    %341 = arith.mulf %336, %340 : vector<16x32xf32>
    %342 = vector.broadcast %215 : vector<1x32xf32> to vector<16x32xf32>
    %343 = arith.mulf %341, %342 : vector<16x32xf32>
    %344 = vector.broadcast %216 : vector<1x32xf32> to vector<16x32xf32>
    %345 = arith.addf %343, %344 : vector<16x32xf32>
    %346 = arith.truncf %345 : vector<16x32xf32> to vector<16x32xbf16>
    %c1_68 = arith.constant 1 : index
    %c0_69 = arith.constant 0 : index
    %c0_70 = arith.constant 0 : index
    %347 = vector.load %arg7[%c1_68, %c0_69, %c0_70] : memref<2x32x64xbf16, #tpu.memory_space<vmem>>, vector<1x32x64xbf16>
    %348 = vector.shape_cast %347 : vector<1x32x64xbf16> to vector<32x64xbf16>
    %cst_71 = arith.constant dense<0.000000e+00> : vector<16x64xf32>
    %349 = tpu.matmul %346, %348, %cst_71 {dimension_numbers = #tpu.dot_dimension_numbers<[1], [0], [0], [1], [0, 0, 1, 1], [], []>} : vector<16x32xbf16>, vector<32x64xbf16>, vector<16x64xf32> -> vector<16x64xf32>
    %350 = vector.broadcast %217 : vector<1x64xf32> to vector<16x64xf32>
    %351 = arith.addf %349, %350 : vector<16x64xf32>
    %352 = arith.mulf %351, %351 : vector<16x64xf32>
    %353 = arith.mulf %351, %352 : vector<16x64xf32>
    %cst_72 = arith.constant 4.471500e-02 : f32
    %354 = vector.broadcast %cst_72 : f32 to vector<16x64xf32>
    %355 = arith.mulf %354, %353 : vector<16x64xf32>
    %356 = arith.addf %351, %355 : vector<16x64xf32>
    %cst_73 = arith.constant 0.797884583 : f32
    %357 = vector.broadcast %cst_73 : f32 to vector<16x64xf32>
    %358 = arith.mulf %357, %356 : vector<16x64xf32>
    %359 = math.tanh %358 : vector<16x64xf32>
    %cst_74 = arith.constant 1.000000e+00 : f32
    %360 = vector.broadcast %cst_74 : f32 to vector<16x64xf32>
    %361 = arith.addf %360, %359 : vector<16x64xf32>
    %cst_75 = arith.constant 5.000000e-01 : f32
    %362 = vector.broadcast %cst_75 : f32 to vector<16x64xf32>
    %363 = arith.mulf %362, %361 : vector<16x64xf32>
    %364 = arith.mulf %351, %363 : vector<16x64xf32>
    %365 = arith.truncf %364 : vector<16x64xf32> to vector<16x64xbf16>
    %c1_76 = arith.constant 1 : index
    %c0_77 = arith.constant 0 : index
    %c0_78 = arith.constant 0 : index
    %366 = vector.load %arg8[%c1_76, %c0_77, %c0_78] : memref<2x64x32xbf16, #tpu.memory_space<vmem>>, vector<1x64x32xbf16>
    %367 = vector.shape_cast %366 : vector<1x64x32xbf16> to vector<64x32xbf16>
    %cst_79 = arith.constant dense<0.000000e+00> : vector<16x32xf32>
    %368 = tpu.matmul %365, %367, %cst_79 {dimension_numbers = #tpu.dot_dimension_numbers<[1], [0], [0], [1], [0, 0, 1, 1], [], []>} : vector<16x64xbf16>, vector<64x32xbf16>, vector<16x32xf32> -> vector<16x32xf32>
    %369 = vector.broadcast %218 : vector<1x32xf32> to vector<16x32xf32>
    %370 = arith.addf %368, %369 : vector<16x32xf32>
    %371 = arith.addf %345, %370 : vector<16x32xf32>
    %cst_80 = arith.constant dense<0.000000e+00> : vector<16xf32>
    %372 = vector.multi_reduction <add>, %371, %cst_80 [1] : vector<16x32xf32> to vector<16xf32>
    %373 = vector.shape_cast %372 : vector<16xf32> to vector<16x1xf32>
    %cst_81 = arith.constant 3.200000e+01 : f32
    %374 = vector.broadcast %cst_81 : f32 to vector<16x1xf32>
    %375 = arith.divf %373, %374 : vector<16x1xf32>
    %376 = arith.mulf %371, %371 : vector<16x32xf32>
    %cst_82 = arith.constant dense<0.000000e+00> : vector<16xf32>
    %377 = vector.multi_reduction <add>, %376, %cst_82 [1] : vector<16x32xf32> to vector<16xf32>
    %378 = vector.shape_cast %377 : vector<16xf32> to vector<16x1xf32>
    %cst_83 = arith.constant 3.200000e+01 : f32
    %379 = vector.broadcast %cst_83 : f32 to vector<16x1xf32>
    %380 = arith.divf %378, %379 : vector<16x1xf32>
    %381 = arith.mulf %375, %375 : vector<16x1xf32>
    %382 = arith.subf %380, %381 : vector<16x1xf32>
    %383 = vector.broadcast %375 : vector<16x1xf32> to vector<16x32xf32>
    %384 = arith.subf %371, %383 : vector<16x32xf32>
    %cst_84 = arith.constant 9.99999974E-6 : f32
    %385 = vector.broadcast %cst_84 : f32 to vector<16x1xf32>
    %386 = arith.addf %382, %385 : vector<16x1xf32>
    %387 = math.rsqrt %386 : vector<16x1xf32>
    %388 = vector.broadcast %387 : vector<16x1xf32> to vector<16x32xf32>
    %389 = arith.mulf %384, %388 : vector<16x32xf32>
    %390 = vector.broadcast %219 : vector<1x32xf32> to vector<16x32xf32>
    %391 = arith.mulf %389, %390 : vector<16x32xf32>
    %392 = vector.broadcast %220 : vector<1x32xf32> to vector<16x32xf32>
    %393 = arith.addf %391, %392 : vector<16x32xf32>
    %c18 = arith.constant 18 : index
    %c0_85 = arith.constant 0 : index
    %394 = vector.load %arg3[%c18, %c0_85] : memref<20x32xf32, #tpu.memory_space<vmem>>, vector<1x32xf32>
    %c19 = arith.constant 19 : index
    %c0_86 = arith.constant 0 : index
    %395 = vector.load %arg3[%c19, %c0_86] : memref<20x32xf32, #tpu.memory_space<vmem>>, vector<1x32xf32>
    %396 = vector.extract_strided_slice %393 {offsets = [0, 0], sizes = [1, 32], strides = [1, 1]} : vector<16x32xf32> to vector<1x32xf32>
    %397 = vector.extract_strided_slice %393 {offsets = [8, 0], sizes = [1, 32], strides = [1, 1]} : vector<16x32xf32> to vector<1x32xf32>
    %398 = tpu.concatenate %396, %397 in 0 : vector<1x32xf32>, vector<1x32xf32> -> vector<2x32xf32>
    %399 = arith.truncf %398 : vector<2x32xf32> to vector<2x32xbf16>
    %c0_87 = arith.constant 0 : index
    %c0_88 = arith.constant 0 : index
    %c0_89 = arith.constant 0 : index
    %400 = vector.load %arg9[%c0_87, %c0_88, %c0_89] : memref<2x32x32xbf16, #tpu.memory_space<vmem>>, vector<1x32x32xbf16>
    %401 = vector.shape_cast %400 : vector<1x32x32xbf16> to vector<32x32xbf16>
    %cst_90 = arith.constant dense<0.000000e+00> : vector<2x32xf32>
    %402 = tpu.matmul %399, %401, %cst_90 {dimension_numbers = #tpu.dot_dimension_numbers<[1], [0], [0], [1], [0, 0, 1, 1], [], []>} : vector<2x32xbf16>, vector<32x32xbf16>, vector<2x32xf32> -> vector<2x32xf32>
    %403 = vector.broadcast %394 : vector<1x32xf32> to vector<2x32xf32>
    %404 = arith.addf %402, %403 : vector<2x32xf32>
    %405 = math.tanh %404 : vector<2x32xf32>
    %406 = arith.truncf %405 : vector<2x32xf32> to vector<2x32xbf16>
    %c1_91 = arith.constant 1 : index
    %c0_92 = arith.constant 0 : index
    %c0_93 = arith.constant 0 : index
    %407 = vector.load %arg9[%c1_91, %c0_92, %c0_93] : memref<2x32x32xbf16, #tpu.memory_space<vmem>>, vector<1x32x32xbf16>
    %408 = vector.shape_cast %407 : vector<1x32x32xbf16> to vector<32x32xbf16>
    %cst_94 = arith.constant dense<0.000000e+00> : vector<2x32xf32>
    %409 = tpu.matmul %406, %408, %cst_94 {dimension_numbers = #tpu.dot_dimension_numbers<[1], [0], [0], [1], [0, 0, 1, 1], [], []>} : vector<2x32xbf16>, vector<32x32xbf16>, vector<2x32xf32> -> vector<2x32xf32>
    %410 = vector.broadcast %395 : vector<1x32xf32> to vector<2x32xf32>
    %411 = arith.addf %409, %410 : vector<2x32xf32>
    %412 = arith.negf %411 : vector<2x32xf32>
    %413 = math.exp %412 : vector<2x32xf32>
    %cst_95 = arith.constant 1.000000e+00 : f32
    %414 = vector.broadcast %cst_95 : f32 to vector<2x32xf32>
    %415 = arith.addf %414, %413 : vector<2x32xf32>
    %416 = arith.divf %414, %415 : vector<2x32xf32>
    %417 = tpu.concatenate %405, %416 in 0 : vector<2x32xf32>, vector<2x32xf32> -> vector<4x32xf32>
    %c0_96 = arith.constant 0 : index
    %c0_97 = arith.constant 0 : index
    %418 = vector.load %arg10[%c0_96, %c0_97] : memref<4x32xf32, #tpu.memory_space<vmem>>, vector<4x32xf32>
    tpu.vector_store %arg10[%c0_96, %c0_97], %417 {strides = array<i32>} : memref<4x32xf32, #tpu.memory_space<vmem>>, vector<4x32xf32>,
    return
  }
  func.func @transform_0(%arg0: i32) -> (i32, i32) {
    %c0_i32 = arith.constant 0 : i32
    %c0_i32_0 = arith.constant 0 : i32
    %c0_i32_1 = arith.constant 0 : i32
    return %c0_i32, %c0_i32_0 : i32, i32
  }
  func.func @transform_1(%arg0: i32) -> (i32, i32, i32) {
    %c0_i32 = arith.constant 0 : i32
    %c0_i32_0 = arith.constant 0 : i32
    %c0_i32_1 = arith.constant 0 : i32
    %c0_i32_2 = arith.constant 0 : i32
    return %c0_i32, %c0_i32_0, %c0_i32_1 : i32, i32, i32
  }
  func.func @transform_2(%arg0: i32) -> (i32, i32) {
    %c0_i32 = arith.constant 0 : i32
    %c0_i32_0 = arith.constant 0 : i32
    %c0_i32_1 = arith.constant 0 : i32
    return %c0_i32, %c0_i32_0 : i32, i32
  }
  func.func @transform_3(%arg0: i32) -> (i32, i32, i32) {
    %c0_i32 = arith.constant 0 : i32
    %c0_i32_0 = arith.constant 0 : i32
    %c0_i32_1 = arith.constant 0 : i32
    %c0_i32_2 = arith.constant 0 : i32
    return %c0_i32, %c0_i32_0, %c0_i32_1 : i32, i32, i32
  }
  func.func @transform_4(%arg0: i32) -> (i32, i32, i32) {
    %c0_i32 = arith.constant 0 : i32
    %c0_i32_0 = arith.constant 0 : i32
    %c0_i32_1 = arith.constant 0 : i32
    %c0_i32_2 = arith.constant 0 : i32
    return %c0_i32, %c0_i32_0, %c0_i32_1 : i32, i32, i32
  }
  func.func @transform_5(%arg0: i32) -> (i32, i32, i32) {
    %c0_i32 = arith.constant 0 : i32
    %c0_i32_0 = arith.constant 0 : i32
    %c0_i32_1 = arith.constant 0 : i32
    %c0_i32_2 = arith.constant 0 : i32
    return %c0_i32, %c0_i32_0, %c0_i32_1 : i32, i32, i32
  }
  func.func @transform_6(%arg0: i32) -> (i32, i32, i32) {
    %c0_i32 = arith.constant 0 : i32
    %c0_i32_0 = arith.constant 0 : i32
    %c0_i32_1 = arith.constant 0 : i32
    %c0_i32_2 = arith.constant 0 : i32
    return %c0_i32, %c0_i32_0, %c0_i32_1 : i32, i32, i32
  }
  func.func @transform_7(%arg0: i32) -> (i32, i32, i32) {
    %c0_i32 = arith.constant 0 : i32
    %c0_i32_0 = arith.constant 0 : i32
    %c0_i32_1 = arith.constant 0 : i32
    %c0_i32_2 = arith.constant 0 : i32
    return %c0_i32, %c0_i32_0, %c0_i32_1 : i32, i32, i32
  }
  func.func @transform_8(%arg0: i32) -> (i32, i32, i32) {
    %c0_i32 = arith.constant 0 : i32
    %c0_i32_0 = arith.constant 0 : i32
    %c0_i32_1 = arith.constant 0 : i32
    %c0_i32_2 = arith.constant 0 : i32
    return %c0_i32, %c0_i32_0, %c0_i32_1 : i32, i32, i32
  }
  func.func @transform_9(%arg0: i32) -> (i32, i32) {
    %c0_i32 = arith.constant 0 : i32
    %c0_i32_0 = arith.constant 0 : i32
    %c0_i32_1 = arith.constant 0 : i32
    return %c0_i32, %c0_i32_0 : i32, i32
  }
}

</mosaic_0001>

<bundles_post_ra>
// kernel: model_forward.1
= control target key start
LH: loop header
LB: loop body
LE: loop exit
PB: predicated region body
PF: predicated region fallthrough
CT: control target
= control target key end

     0   :  { %vm49_vm0 = vcmask 261120   ;;  %v2193_v12 = vmov 32.0   ;;  %s2194_s26 = smov 104   ;;  %s2195_s27 = smov 120   ;;  %vm204_vm8 = vcmask 64512   ;;  %vm493_vm9 = vcmask 1043456   ;;  %s2791_s0 = inlined_call_operand.vmem [shape: f32[16,32], index: 0, kind: input, shape index: {}]   ;;  %s2792_s2 = inlined_call_operand.vmem [shape: f32[20,32], index: 2, kind: input, shape index: {}]   ;;  %s2793_s4 = inlined_call_operand.vmem [shape: bf16[2,32,96], index: 4, kind: input, shape index: {}]   ;;  %s2794_s3 = inlined_call_operand.vmem [shape: f32[2,8,96], index: 3, kind: input, shape index: {}]   ;;  %s2795_s1 = inlined_call_operand.vmem [shape: f32[8,1,8], index: 1, kind: input, shape index: {}]   ;;  %s2796_s5 = inlined_call_operand.vmem [shape: bf16[2,32,32], index: 5, kind: input, shape index: {}]   ;;  %s2797_s6 = inlined_call_operand.vmem [shape: bf16[2,32,64], index: 6, kind: input, shape index: {}]   ;;  %s2798_s7 = inlined_call_operand.vmem [shape: bf16[2,64,32], index: 7, kind: input, shape index: {}]   ;;  %s2799_s8 = inlined_call_operand.vmem [shape: bf16[2,32,32], index: 8, kind: input, shape index: {}]   ;;  %s2800_s9 = inlined_call_operand.vmem [shape: f32[4,32], index: 9, kind: output, shape index: {}]  }
   0x1   :  { %v41_v0 = vld [vmem:[%s2791_s0] sm:$0xff]  ;;  %v42_v2 = vld [vmem:[%s2791_s0 + $0x8] sm:$0xff]  ;;  %2093 = vrcp.f32 %v2193_v12  ;;  %v2081_v49 = vld [vmem:[%s2792_s2 + $0x10] ss:$0 sm:$0xff]  ;;  %s2196_s28 = smov 112   ;;  %s2197_s29 = smov 96  }
   0x2   :  { %v43_v1 = vld [vmem:[%s2792_s2] sm:$0xff]  ;;  %v44_v4 = vld [vmem:[%s2792_s2 + $0x8] sm:$0xff]  ;;  %v2082_v55 = vld [vmem:[%s2792_s2 + $0x11] ss:$0 sm:$0xff]  ;;  %s2198_s24 = smov 64   ;;  %s2200_s25 = smov 8  }
   0x3   :  { %v45_v3 = vadd.f32 %v43_v1, %v41_v0  ;;  %v2265_v7 = vadd.f32 %v44_v4, %v42_v2  ;;  %v2019_v22 = vld [vmem:[%s2793_s4 + $0x8] sm:$0xff]  ;;  %v2018_v25 = vld [vmem:[%s2793_s4] sm:$0xff]  ;;  %s2201_s30 = smov 16   ;;  %vm670_vm10 = vcmask 130048   ;;  %vm672_vm11 = vcmask 195584  }
   0x4   :  { %139 = vmatpush.bf16.msra.mxu0 %v2019_v22  ;;  %v2302_v60 = vld [vmem:[%s2794_s3] sm:$0xff] }
   0x5   :  { %v50_v5 = vsel %vm49_vm0, %v45_v3, 0.0  ;;  %v65_v6 = vmul.f32 %v45_v3, %v45_v3  ;;  %v66_v9 = vmul.f32 %v2265_v7, %v2265_v7  ;;  %v53_v10 = vsel %vm49_vm0, %v2265_v7, 0.0 }
   0x6   :  { %51 = vadd.xlane.f32.xlu0 %v50_v5  ;;  %v117_v61 = vperm.slane %v2302_v60, 0 }
   0x7   :  { %v67_v8 = vsel %vm49_vm0, %v65_v6, 0.0  ;;  %v70_v11 = vsel %vm49_vm0, %v66_v9, 0.0  ;;  %v2094_v13 = vpop.eup %2093 }
   0x8   :  { %68 = vadd.xlane.f32.xlu1 %v67_v8  ;;  %v57_v14 = vmul.f32 32.0, %v2094_v13  ;;  %vm61_vm1 = vweird.f32 %v2094_v13  ;;  %140 = vmatpush.bf16.msra.mxu0 %v2018_v25 }
   0xa   :  { %v58_v15 = vsub.f32 1.0, %v57_v14 }
   0xc   :  { %v59_v16 = vmul.f32 %v2094_v13, %v58_v15 }
   0xe   :  { %54 = vadd.xlane.f32.xlu0 %v53_v10  ;;  %v60_v17 = vadd.f32 %v2094_v13, %v59_v16 }
  0x10   :  { %71 = vadd.xlane.f32.xlu1 %v70_v11  ;;  %v2273_v18 = vsel %vm61_vm1, %v2094_v13, %v60_v17 }
  0x79   :  { %v52_v19 = vpop.xlane.xlu0 %51 }
  0x7a   :  { %v63_v20 = vmul.f32 %v2273_v18, %v52_v19 }
  0x7b   :  { %v69_v21 = vpop.xlane.xlu1 %68 }
  0x7c   :  { %v75_v23 = vmul.f32 %v63_v20, %v63_v20  ;;  %v73_v24 = vmul.f32 %v69_v21, %v2273_v18  ;;  %v79_v46 = vsub.f32 %v45_v3, %v63_v20 }
  0x7e   :  { %v77_v26 = vsub.f32 %v73_v24, %v75_v23 }
  0x80   :  { %v81_v27 = vadd.f32 1e-05, %v77_v26 }
  0x81   :  { %v55_v28 = vpop.xlane.xlu0 %54 }
  0x82   :  { %2095 = vrsqrt.f32 %v81_v27  ;;  %v64_v29 = vmul.f32 %v2273_v18, %v55_v28  ;;  %vm89_vm3 = vweird.f32 %v81_v27 }
  0x83   :  { %v72_v30 = vpop.xlane.xlu1 %71 }
  0x84   :  { %v76_v31 = vmul.f32 %v64_v29, %v64_v29  ;;  %v74_v32 = vmul.f32 %v72_v30, %v2273_v18  ;;  %v80_v51 = vsub.f32 %v2265_v7, %v64_v29 }
  0x86   :  { %v78_v33 = vsub.f32 %v74_v32, %v76_v31 }
  0x88   :  { %v2096_v34 = vpop.eup %2095  ;;  %v82_v35 = vadd.f32 1e-05, %v78_v33 }
  0x89   :  { %v84_v36 = vmul.f32 %v2096_v34, %v81_v27  ;;  %vm90_vm2 = vweird.f32 %v2096_v34 }
  0x8a   :  { %2097 = vrsqrt.f32 %v82_v35  ;;  %vm91_vm4 = vmor %vm89_vm3, %vm90_vm2  ;;  %vm99_vm6 = vweird.f32 %v82_v35  ;;  %vm867_vm3 = vcmask 523264  }
  0x8b   :  { %v85_v37 = vmul.f32 %v2096_v34, %v84_v36 }
  0x8d   :  { %v86_v38 = vmul.f32 0.5, %v85_v37 }
  0x8f   :  { %v87_v39 = vsub.f32 1.5, %v86_v38 }
  0x90   :  { %v2098_v40 = vpop.eup %2097 }
  0x91   :  { %v88_v41 = vmul.f32 %v2096_v34, %v87_v39  ;;  %v94_v42 = vmul.f32 %v2098_v40, %v82_v35  ;;  %vm100_vm5 = vweird.f32 %v2098_v40 }
  0x92   :  { %vm101_vm7 = vmor %vm99_vm6, %vm100_vm5 }
  0x93   :  { %v95_v43 = vmul.f32 %v2098_v40, %v94_v42  ;;  %v92_v44 = vsel %vm91_vm4, %v2096_v34, %v88_v41 }
  0x94   :  { %v103_v48 = vmul.f32 %v92_v44, %v79_v46 }
  0x95   :  { %v96_v45 = vmul.f32 0.5, %v95_v43 }
  0x96   :  { %v106_v54 = vmul.f32 %v2081_v49, %v103_v48 }
  0x97   :  { %v97_v47 = vsub.f32 1.5, %v96_v45 }
  0x98   :  { %v2292_v57 = vadd.f32 %v2082_v55, %v106_v54 }
  0x99   :  { %v98_v50 = vmul.f32 %v2098_v40, %v97_v47 }
  0x9b   :  { %v102_v52 = vsel %vm101_vm7, %v2098_v40, %v98_v50 }
  0x9c   :  { %v104_v53 = vmul.f32 %v102_v52, %v80_v51  ;;  %v2362_v51 = vld [vmem:[%s2795_s1 + $0x3] ss:$0 sm:$0xff] }
  0x9e   :  { %v107_v56 = vmul.f32 %v2081_v49, %v104_v53 }
  0xa0   :  { %v2294_v58 = vadd.f32 %v2082_v55, %v107_v56  ;;  %v2369_v56 = vld [vmem:[%s2795_s1 + $0x2] ss:$0 sm:$0xff] }
  0xa2   :  { %v112_v59 = vpack.c.bf16 %v2294_v58, %v2292_v57 }
  0xa4   :  { %1862 = vmatmul.msk.bf16.vlgmr.msra.gmra.mxu0 %vm49_vm0, %v112_v59  ;;  %v2374_v59 = vld [vmem:[%s2795_s1 + $0x7] ss:$0 sm:$0xff] }
 0x121   :  { %v142_v62 = vpop.f32.mrf.mxu0 }
 0x122   :  { %v143_v63 = vadd.f32 %v142_v62, %v117_v61 }
 0x124   :  { %154 = vrot.lane.b32.xlu0 %v143_v63, %s2194_s26  ;;  %148 = vrot.lane.b32.xlu2 %v143_v63, %s2195_s27  ;;  %v167_v30 = vpack.c.bf16 %v143_v63, %v143_v63 }
 0x126   :  { %v200_v31 = vunpack.c.l.b16 %v167_v30 }
 0x128   :  { %v2339_v32 = vpack.c.b16 %v200_v31, %v200_v31 }
 0x129   :  { %v144_v0 = vpop.f32.mrf.mxu0 }
 0x12a   :  { %v145_v1 = vadd.f32 %v144_v0, %v117_v61 }
 0x12c   :  { %158 = vrot.lane.b32.xlu1 %v145_v1, %s2195_s27  ;;  %151 = vrot.lane.b32.xlu2 %v143_v63, %s2196_s28  ;;  %v171_v14 = vpack.c.bf16 %v145_v1, %v145_v1 }
 0x12e   :  { %v297_v17 = vunpack.c.l.b16 %v171_v14 }
 0x130   :  { %v2325_v23 = vpack.c.b16 %v297_v17, %v297_v17  ;;  %v2404_v17 = vld [vmem:[%s2795_s1 + $0x1] ss:$0 sm:$0xff] }
 0x134   :  { %161 = vrot.lane.b32.xlu2 %v145_v1, %s2196_s28 }
 0x13c   :  { %164 = vrot.lane.b32.xlu2 %v145_v1, %s2194_s26 }
 0x17e   :  { %v149_v2 = vpop.permute.xlu2 %148 }
 0x17f   :  { %v168_v3 = vpack.c.bf16 %v149_v2, %v149_v2 }
 0x181   :  { %v225_v4 = vunpack.c.l.b16 %v168_v3 }
 0x183   :  { %v2311_v5 = vpack.c.b16 %v225_v4, %v225_v4 }
 0x185   :  { %227 = vrot.lane.b32.xlu2 %v2311_v5, %s2197_s29 }
 0x186   :  { %v152_v6 = vpop.permute.xlu2 %151 }
 0x187   :  { %v169_v7 = vpack.c.bf16 %v152_v6, %v152_v6  ;;  %v2386_v6 = vld [vmem:[%s2795_s1 + $0x6] ss:$0 sm:$0xff] }
 0x189   :  { %v249_v8 = vunpack.c.l.b16 %v169_v7 }
 0x18b   :  { %v2315_v9 = vpack.c.b16 %v249_v8, %v249_v8 }
 0x18d   :  { %251 = vrot.lane.b32.xlu0 %v2315_v9, %s2197_s29 }
 0x18e   :  { %v162_v10 = vpop.permute.xlu2 %161 }
 0x18f   :  { %v173_v11 = vpack.c.bf16 %v162_v10, %v162_v10 }
 0x191   :  { %v345_v12 = vunpack.c.l.b16 %v173_v11 }
 0x193   :  { %v2319_v13 = vpack.c.b16 %v345_v12, %v345_v12 }
 0x195   :  { %347 = vrot.lane.b32.xlu0 %v2319_v13, %s2197_s29 }
 0x196   :  { %v155_v15 = vpop.permute.xlu0 %154  ;;  %v165_v19 = vpop.permute.xlu2 %164 }
 0x197   :  { %v170_v16 = vpack.c.bf16 %v155_v15, %v155_v15  ;;  %v174_v22 = vpack.c.bf16 %v165_v19, %v165_v19 }
 0x199   :  { %v273_v20 = vunpack.c.l.b16 %v170_v16  ;;  %v369_v25 = vunpack.c.l.b16 %v174_v22 }
 0x19b   :  { %v2323_v21 = vpack.c.b16 %v273_v20, %v273_v20  ;;  %v2331_v28 = vpack.c.b16 %v369_v25, %v369_v25  ;;  %v2412_v25 = vld [vmem:[%s2795_s1 + $0x5] ss:$0 sm:$0xff] }
 0x19d   :  { %275 = vrot.lane.b32.xlu2 %v2323_v21, %s2197_s29  ;;  %299 = vrot.lane.b32.xlu0 %v2325_v23, %s2197_s29 }
 0x19e   :  { %v159_v24 = vpop.permute.xlu1 %158 }
 0x19f   :  { %v172_v26 = vpack.c.bf16 %v159_v24, %v159_v24 }
 0x1a1   :  { %v321_v27 = vunpack.c.l.b16 %v172_v26 }
 0x1a3   :  { %v2333_v29 = vpack.c.b16 %v321_v27, %v321_v27  ;;  %v2418_v27 = vld [vmem:[%s2795_s1 + $0x4] ss:$0 sm:$0xff] }
 0x1a5   :  { %323 = vrot.lane.b32.xlu1 %v2333_v29, %s2197_s29  ;;  %371 = vrot.lane.b32.xlu2 %v2331_v28, %s2197_s29 }
 0x1ad   :  { %202 = vrot.lane.b32.xlu1 %v2339_v32, %s2197_s29 }
 0x1df   :  { %v228_v33 = vpop.permute.xlu2 %227 }
 0x1e0   :  { %v233_v34 = vsel %vm204_vm8, %v228_v33, 0 }
 0x1e1   :  { %242 = vmatpush.bf16.xpose.msra.mxu2 %v233_v34 }
 0x1e8   :  { %1864 = vmatmul.msk.bf16.vlgmr.msra.gmra.mxu2 %vm204_vm8, %v168_v3 }
 0x1f7   :  { %v276_v35 = vpop.permute.xlu2 %275 }
 0x1f8   :  { %v281_v36 = vsel %vm204_vm8, %v276_v35, 0 }
 0x1f9   :  { %290 = vmatpush.bf16.xpose.msrb.mxu0 %v281_v36 }
 0x1ff   :  { %v252_v37 = vpop.permute.xlu0 %251  ;;  %v372_v38 = vpop.permute.xlu2 %371 }
 0x200   :  { %v377_v39 = vsel %vm204_vm8, %v372_v38, 0  ;;  %1866 = vmatmul.msk.bf16.vlgmr.msrb.gmra.mxu0 %vm204_vm8, %v170_v16  ;;  %v257_v40 = vsel %vm204_vm8, %v252_v37, 0 }
 0x201   :  { %266 = vmatpush.bf16.xpose.msra.mxu3 %v257_v40  ;;  %386 = vmatpush.bf16.xpose.msra.mxu0 %v377_v39 }
 0x207   :  { %v348_v41 = vpop.permute.xlu0 %347 }
 0x208   :  { %1865 = vmatmul.msk.bf16.vlgmr.msra.gmra.mxu3 %vm204_vm8, %v169_v7  ;;  %v353_v42 = vsel %vm204_vm8, %v348_v41, 0 }
 0x209   :  { %362 = vmatpush.bf16.xpose.msrb.mxu3 %v353_v42 }
 0x20f   :  { %v300_v45 = vpop.permute.xlu0 %299 }
 0x210   :  { %1870 = vmatmul.msk.bf16.vlgmr.msra.gmra.mxu0 %vm204_vm8, %v174_v22  ;;  %v305_v48 = vsel %vm204_vm8, %v300_v45, 0 }
 0x217   :  { %v324_v43 = vpop.permute.xlu1 %323 }
 0x218   :  { %1869 = vmatmul.msk.bf16.vlgmr.msrb.gmra.mxu3 %vm204_vm8, %v173_v11  ;;  %v329_v44 = vsel %vm204_vm8, %v324_v43, 0  ;;  %v2396_v11 = vld [vmem:[%s2795_s1] ss:$0 sm:$0xff]  ;;  %s2199_s1 = smov 24  }
 0x219   :  { %338 = vmatpush.bf16.xpose.msrb.mxu2 %v329_v44 }
 0x21f   :  { %v203_v46 = vpop.permute.xlu1 %202 }
 0x220   :  { %1868 = vmatmul.msk.bf16.vlgmr.msrb.gmra.mxu2 %vm204_vm8, %v172_v26  ;;  %v209_v47 = vsel %vm204_vm8, %v203_v46, 0 }
 0x221   :  { %218 = vmatpush.bf16.xpose.msra.mxu1 %v209_v47 }
 0x228   :  { %1863 = vmatmul.msk.bf16.vlgmr.msra.gmra.mxu1 %vm204_vm8, %v167_v30 }
 0x229   :  { %314 = vmatpush.bf16.xpose.msrb.mxu1 %v305_v48 }
 0x238   :  { %1867 = vmatmul.msk.bf16.vlgmr.msrb.gmra.mxu1 %vm204_vm8, %v171_v14 }
 0x26b   :  { %v244_v49 = vpop.f32.mrf.mxu2 }
 0x26c   :  { %v245_v22 = vadd.f32 %v2404_v17, %v244_v49 }
 0x26e   :  { %v395_v26 = vsel %vm204_vm8, %v245_v22, -inf }
 0x273   :  { %v246_v50 = vpop.f32.mrf.mxu2 }
 0x27d   :  { %v292_v52 = vpop.f32.mrf.mxu0 }
 0x27e   :  { %v293_v53 = vadd.f32 %v2362_v51, %v292_v52 }
 0x280   :  { %v401_v54 = vsel %vm204_vm8, %v293_v53, -inf }
 0x281   :  { %402 = vmax.xlane.f32.xlu0 %v401_v54 }
 0x285   :  { %v294_v55 = vpop.f32.mrf.mxu0 }
 0x28b   :  { %v268_v61 = vpop.f32.mrf.mxu3 }
 0x28c   :  { %v269_v62 = vadd.f32 %v2369_v56, %v268_v61 }
 0x28d   :  { %v388_v63 = vpop.f32.mrf.mxu0 }
 0x28e   :  { %v2378_v0 = vadd.f32 %v2374_v59, %v388_v63  ;;  %v398_v1 = vsel %vm204_vm8, %v269_v62, -inf }
 0x28f   :  { %399 = vmax.xlane.f32.xlu1 %v398_v1 }
 0x290   :  { %v413_v2 = vsel %vm204_vm8, %v2378_v0, -inf }
 0x291   :  { %414 = vmax.xlane.f32.xlu0 %v413_v2 }
 0x293   :  { %v270_v3 = vpop.f32.mrf.mxu3 }
 0x295   :  { %v390_v4 = vpop.f32.mrf.mxu0 }
 0x29b   :  { %v364_v7 = vpop.f32.mrf.mxu3 }
 0x29c   :  { %v2389_v8 = vadd.f32 %v2386_v6, %v364_v7 }
 0x29e   :  { %v410_v10 = vsel %vm204_vm8, %v2389_v8, -inf }
 0x29f   :  { %411 = vmax.xlane.f32.xlu1 %v410_v10 }
 0x2a3   :  { %v340_v12 = vpop.f32.mrf.mxu2  ;;  %v366_v14 = vpop.f32.mrf.mxu3 }
 0x2a4   :  { %v341_v30 = vadd.f32 %v2412_v25, %v340_v12 }
 0x2a5   :  { %v220_v15 = vpop.f32.mrf.mxu1 }
 0x2a6   :  { %v2399_v16 = vadd.f32 %v2396_v11, %v220_v15  ;;  %v407_v35 = vsel %vm204_vm8, %v341_v30, -inf }
 0x2a8   :  { %v392_v19 = vsel %vm204_vm8, %v2399_v16, -inf }
 0x2a9   :  { %393 = vmax.xlane.f32.xlu2 %v392_v19 }
 0x2ab   :  { %v342_v20 = vpop.f32.mrf.mxu2 }
 0x2ad   :  { %v222_v24 = vpop.f32.mrf.mxu1 }
 0x2b1   :  { %396 = vmax.xlane.f32.xlu2 %v395_v26 }
 0x2b5   :  { %v316_v31 = vpop.f32.mrf.mxu1 }
 0x2b6   :  { %v317_v33 = vadd.f32 %v2418_v27, %v316_v31 }
 0x2b8   :  { %v404_v34 = vsel %vm204_vm8, %v317_v33, -inf }
 0x2b9   :  { %405 = vmax.xlane.f32.xlu0 %v404_v34  ;;  %408 = vmax.xlane.f32.xlu2 %v407_v35 }
 0x2bd   :  { %v318_v36 = vpop.f32.mrf.mxu1 }
 0x2cd   :  { %552 = vrot.lane.b32.xlu0 %v2323_v21, %s2198_s24 }
 0x2d5   :  { %594 = vrot.lane.b32.xlu0 %v2333_v29, %s2198_s24 }
 0x2dd   :  { %615 = vrot.lane.b32.xlu0 %v2319_v13, %s2198_s24 }
 0x2f4   :  { %v403_v37 = vpop.xlane.xlu0 %402 }
 0x2f5   :  { %v419_v38 = vsub.f32 %v293_v53, %v403_v37 }
 0x2f7   :  { %v430_v39 = vmul.f32 1.442695, %v419_v38 }
 0x2f9   :  { %2099 = vpow2.f32 %v430_v39 }
 0x2ff   :  { %v2430_v40 = vpop.eup %2099 }
 0x300   :  { %v449_v41 = vsel %vm204_vm8, %v2430_v40, 0.0 }
 0x301   :  { %450 = vadd.xlane.f32.xlu2 %v449_v41 }
 0x302   :  { %v400_v42 = vpop.xlane.xlu1 %399 }
 0x303   :  { %v418_v43 = vsub.f32 %v269_v62, %v400_v42 }
 0x304   :  { %v415_v49 = vpop.xlane.xlu0 %414 }
 0x305   :  { %v428_v44 = vmul.f32 1.442695, %v418_v43  ;;  %v423_v54 = vsub.f32 %v2378_v0, %v415_v49 }
 0x307   :  { %2101 = vpow2.f32 %v428_v44  ;;  %v438_v61 = vmul.f32 1.442695, %v423_v54 }
 0x30d   :  { %v2434_v21 = vpop.eup %2101 }
 0x30e   :  { %v446_v29 = vsel %vm204_vm8, %v2434_v21, 0.0 }
 0x30f   :  { %447 = vadd.xlane.f32.xlu0 %v446_v29 }
 0x312   :  { %v412_v14 = vpop.xlane.xlu1 %411 }
 0x313   :  { %v422_v15 = vsub.f32 %v2389_v8, %v412_v14 }
 0x315   :  { %v436_v19 = vmul.f32 1.442695, %v422_v15 }
 0x319   :  { %531 = vrot.lane.b32.xlu2 %v2315_v9, %s2198_s24 }
 0x31c   :  { %v394_v13 = vpop.xlane.xlu2 %393 }
 0x31d   :  { %v416_v20 = vsub.f32 %v2399_v16, %v394_v13 }
 0x324   :  { %v397_v45 = vpop.xlane.xlu2 %396 }
 0x325   :  { %v417_v46 = vsub.f32 %v245_v22, %v397_v45  ;;  %v424_v22 = vmul.f32 1.442695, %v416_v20 }
 0x327   :  { %v426_v47 = vmul.f32 1.442695, %v417_v46 }
 0x329   :  { %2103 = vpow2.f32 %v426_v47 }
 0x32c   :  { %v409_v48 = vpop.xlane.xlu2 %408  ;;  %v406_v9 = vpop.xlane.xlu0 %405 }
 0x32d   :  { %v421_v50 = vsub.f32 %v341_v30, %v409_v48  ;;  %v420_v63 = vsub.f32 %v317_v33, %v406_v9 }
 0x32f   :  { %v2440_v52 = vpop.eup %2103  ;;  %v434_v53 = vmul.f32 1.442695, %v421_v50  ;;  %v432_v2 = vmul.f32 1.442695, %v420_v63 }
 0x330   :  { %v443_v55 = vsel %vm204_vm8, %v2440_v52, 0.0 }
 0x331   :  { %444 = vadd.xlane.f32.xlu1 %v443_v55  ;;  %2105 = vpow2.f32 %v434_v53 }
 0x332   :  { %2107 = vpow2.f32 %v438_v61 }
 0x333   :  { %2109 = vpow2.f32 %v432_v2 }
 0x334   :  { %2111 = vpow2.f32 %v436_v19 }
 0x335   :  { %2113 = vpow2.f32 %v424_v22 }
 0x337   :  { %v2445_v62 = vpop.eup %2105 }
 0x338   :  { %v455_v1 = vsel %vm204_vm8, %v2445_v62, 0.0  ;;  %v2108_v3 = vpop.eup %2107 }
 0x339   :  { %456 = vadd.xlane.f32.xlu0 %v455_v1  ;;  %v461_v7 = vsel %vm204_vm8, %v2108_v3, 0.0  ;;  %v2451_v10 = vpop.eup %2109 }
 0x33a   :  { %v452_v12 = vsel %vm204_vm8, %v2451_v10, 0.0  ;;  %v2112_v24 = vpop.eup %2111 }
 0x33b   :  { %v458_v30 = vsel %vm204_vm8, %v2112_v24, 0.0 }
 0x33f   :  { %v553_v4 = vpop.permute.xlu0 %552 }
 0x340   :  { %v558_v0 = vsel %vm493_vm9, %v553_v4, 0 }
 0x341   :  { %567 = vmatpush.bf16.msrb.mxu0 %v558_v0 }
 0x342   :  { %462 = vadd.xlane.f32.xlu2 %v461_v7 }
 0x347   :  { %v595_v26 = vpop.permute.xlu0 %594 }
 0x34a   :  { %453 = vadd.xlane.f32.xlu2 %v452_v12  ;;  %510 = vrot.lane.b32.xlu1 %v2311_v5, %s2198_s24  ;;  %v2114_v5 = vpop.eup %2113 }
 0x34d   :  { %636 = vrot.lane.b32.xlu0 %v2331_v28, %s2198_s24  ;;  %v440_v28 = vsel %vm204_vm8, %v2114_v5, 0.0 }
 0x34f   :  { %v616_v8 = vpop.permute.xlu0 %615 }
 0x350   :  { %v621_v35 = vsel %vm493_vm9, %v616_v8, 0 }
 0x362   :  { %573 = vrot.lane.b32.xlu2 %v2325_v23, %s2198_s24 }
 0x374   :  { %v451_v31 = vpop.xlane.xlu2 %450  ;;  %459 = vadd.xlane.f32.xlu1 %v458_v30 }
 0x375   :  { %2115 = vrcp.f32 %v451_v31 }
 0x377   :  { %441 = vadd.xlane.f32.xlu0 %v440_v28 }
 0x37b   :  { %v2116_v33 = vpop.eup %2115 }
 0x37c   :  { %v475_v23 = vmul.f32 %v2116_v33, %v2430_v40  ;;  %v532_v34 = vpop.permute.xlu2 %531 }
 0x37d   :  { %v537_v16 = vsel %vm493_vm9, %v532_v34, 0 }
 0x37e   :  { %v483_v36 = vpack.c.bf16 %v475_v23, %v475_v23  ;;  %546 = vmatpush.bf16.msra.mxu3 %v537_v16 }
 0x380   :  { %1874 = vmatmul.msk.bf16.vlgmr.msrb.gmra.mxu0 %vm204_vm8, %v483_v36 }
 0x382   :  { %630 = vmatpush.bf16.msrb.mxu3 %v621_v35  ;;  %v448_v37 = vpop.xlane.xlu0 %447 }
 0x383   :  { %2117 = vrcp.f32 %v448_v37 }
 0x389   :  { %v2118_v38 = vpop.eup %2117 }
 0x38a   :  { %v474_v39 = vmul.f32 %v2118_v38, %v2434_v21  ;;  %v600_v21 = vsel %vm493_vm9, %v595_v26, 0 }
 0x38c   :  { %v482_v41 = vpack.c.bf16 %v474_v39, %v474_v39 }
 0x38d   :  { %488 = vrot.lane.b32.xlu1 %v2339_v32, %s2198_s24 }
 0x38e   :  { %1873 = vmatmul.msk.bf16.vlgmr.msra.gmra.mxu3 %vm204_vm8, %v482_v41 }
 0x3a4   :  { %v445_v40 = vpop.xlane.xlu1 %444 }
 0x3a5   :  { %2119 = vrcp.f32 %v445_v40  ;;  %v2021_v40 = vld [vmem:[%s2796_s5 + $0x8] sm:$0xff] }
 0x3ab   :  { %v2120_v43 = vpop.eup %2119 }
 0x3ac   :  { %v457_v44 = vpop.xlane.xlu0 %456  ;;  %v473_v29 = vmul.f32 %v2120_v43, %v2440_v52 }
 0x3ae   :  { %v481_v47 = vpack.c.bf16 %v473_v29, %v473_v29 }
 0x3b5   :  { %v463_v42 = vpop.xlane.xlu2 %462 }
 0x3b6   :  { %2121 = vrcp.f32 %v463_v42  ;;  %v2020_v42 = vld [vmem:[%s2796_s5] sm:$0xff] }
 0x3b7   :  { %2123 = vrcp.f32 %v457_v44 }
 0x3bc   :  { %v2122_v13 = vpop.eup %2121  ;;  %v511_v45 = vpop.permute.xlu1 %510 }
 0x3bd   :  { %v516_v46 = vsel %vm493_vm9, %v511_v45, 0  ;;  %v479_v48 = vmul.f32 %v2122_v13, %v2108_v3  ;;  %v2124_v52 = vpop.eup %2123  ;;  %v454_v2 = vpop.xlane.xlu2 %453 }
 0x3be   :  { %525 = vmatpush.bf16.msra.mxu2 %v516_v46  ;;  %v477_v53 = vmul.f32 %v2124_v52, %v2445_v62 }
 0x3bf   :  { %v637_v32 = vpop.permute.xlu0 %636  ;;  %v487_v50 = vpack.c.bf16 %v479_v48, %v479_v48 }
 0x3c0   :  { %v642_v49 = vsel %vm493_vm9, %v637_v32, 0  ;;  %v485_v54 = vpack.c.bf16 %v477_v53, %v477_v53 }
 0x3c1   :  { %1872 = vmatmul.msk.bf16.vlgmr.msra.gmra.mxu2 %vm204_vm8, %v481_v47  ;;  %651 = vmatpush.bf16.msra.mxu0 %v642_v49 }
 0x3c2   :  { %609 = vmatpush.bf16.msrb.mxu2 %v600_v21 }
 0x3c4   :  { %1878 = vmatmul.msk.bf16.vlgmr.msra.gmra.mxu0 %vm204_vm8, %v487_v50 }
 0x3c5   :  { %v574_v0 = vpop.permute.xlu2 %573 }
 0x3c6   :  { %v579_v14 = vsel %vm493_vm9, %v574_v0, 0 }
 0x3d1   :  { %1876 = vmatmul.msk.bf16.vlgmr.msrb.gmra.mxu2 %vm204_vm8, %v485_v54 }
 0x3e7   :  { %v460_v55 = vpop.xlane.xlu1 %459 }
 0x3e8   :  { %2125 = vrcp.f32 %v460_v55 }
 0x3ea   :  { %v442_v1 = vpop.xlane.xlu0 %441 }
 0x3eb   :  { %2127 = vrcp.f32 %v442_v1 }
 0x3ec   :  { %2129 = vrcp.f32 %v454_v2 }
 0x3ee   :  { %v2126_v61 = vpop.eup %2125 }
 0x3ef   :  { %v478_v9 = vmul.f32 %v2126_v61, %v2112_v24  ;;  %v694_v61 = vperm.slane %v2302_v60, 1 }
 0x3f1   :  { %v486_v63 = vpack.c.bf16 %v478_v9, %v478_v9  ;;  %v2128_v3 = vpop.eup %2127 }
 0x3f2   :  { %v472_v7 = vmul.f32 %v2128_v3, %v2114_v5  ;;  %v2130_v20 = vpop.eup %2129 }
 0x3f3   :  { %1877 = vmatmul.msk.bf16.vlgmr.msrb.gmra.mxu3 %vm204_vm8, %v486_v63  ;;  %v476_v22 = vmul.f32 %v2130_v20, %v2451_v10 }
 0x3f4   :  { %v480_v15 = vpack.c.bf16 %v472_v7, %v472_v7 }
 0x3f5   :  { %v484_v26 = vpack.c.bf16 %v476_v22, %v476_v22 }
 0x3fd   :  { %v569_v4 = vpop.f32.mrf.mxu0 }
 0x3ff   :  { %v489_v12 = vpop.permute.xlu1 %488 }
 0x400   :  { %v495_v62 = vsel %vm493_vm9, %v489_v12, 0 }
 0x401   :  { %504 = vmatpush.bf16.msra.mxu1 %v495_v62 }
 0x404   :  { %1871 = vmatmul.msk.bf16.vlgmr.msra.gmra.mxu1 %vm204_vm8, %v480_v15 }
 0x405   :  { %588 = vmatpush.bf16.msrb.mxu1 %v579_v14  ;;  %v571_v19 = vpop.f32.mrf.mxu0 }
 0x409   :  { %716 = vmatpush.bf16.msra.mxu1 %v2021_v40 }
 0x40d   :  { %717 = vmatpush.bf16.msra.mxu1 %v2020_v42 }
 0x411   :  { %v548_v24 = vpop.f32.mrf.mxu3 }
 0x414   :  { %1875 = vmatmul.msk.bf16.vlgmr.msrb.gmra.mxu1 %vm204_vm8, %v484_v26  ;;  %v2023_v26 = vld [vmem:[%s2797_s6 + $0x8] sm:$0xff] }
 0x415   :  { %807 = vmatpush.bf16.msra.mxu2 %v2023_v26 }
 0x419   :  { %v550_v30 = vpop.f32.mrf.mxu3 }
 0x441   :  { %v653_v5 = vpop.f32.mrf.mxu0 }
 0x442   :  { %v2061_v31 = vpack.i.bf16 %v653_v5, %v569_v4 }
 0x444   :  { %v527_v28 = vpop.f32.mrf.mxu2  ;;  %2062 = vrot.lane.b32.xlu2 %v2061_v31, %s2199_s1 }
 0x449   :  { %v655_v8 = vpop.f32.mrf.mxu0 }
 0x44c   :  { %v529_v33 = vpop.f32.mrf.mxu2 }
 0x454   :  { %v611_v23 = vpop.f32.mrf.mxu2 }
 0x455   :  { %v2051_v34 = vpack.i.bf16 %v611_v23, %v527_v28 }
 0x457   :  { %2052 = vrot.lane.b32.xlu1 %v2051_v34, %s2200_s25 }
 0x45c   :  { %v613_v16 = vpop.f32.mrf.mxu2 }
 0x476   :  { %v632_v10 = vpop.f32.mrf.mxu3 }
 0x477   :  { %v2056_v35 = vpack.i.bf16 %v632_v10, %v548_v24 }
 0x479   :  { %2057 = vrot.lane.b32.xlu1 %v2056_v35, %s2201_s30 }
 0x47e   :  { %v634_v36 = vpop.f32.mrf.mxu3 }
 0x481   :  { %v506_v37 = vpop.f32.mrf.mxu1 }
 0x489   :  { %v508_v38 = vpop.f32.mrf.mxu1 }
 0x491   :  { %v590_v39 = vpop.f32.mrf.mxu1 }
 0x499   :  { %v592_v41 = vpop.f32.mrf.mxu1 }
 0x49e   :  { %v2063_v13 = vpop.permute.xlu2 %2062 }
 0x49f   :  { %v2065_v47 = vunpack.i.h.bf16 %v2063_v13  ;;  %v2064_v48 = vunpack.i.l.bf16 %v2063_v13 }
 0x4c9   :  { %v2053_v43 = vpop.permute.xlu1 %2052 }
 0x4ca   :  { %v2055_v44 = vunpack.i.h.bf16 %v2053_v43  ;;  %v2054_v29 = vunpack.i.l.bf16 %v2053_v43 }
 0x4cc   :  { %v686_v32 = vsel %vm204_vm8, %v590_v39, %v2055_v44  ;;  %v669_v49 = vsel %vm204_vm8, %v506_v37, %v2054_v29 }
 0x4eb   :  { %v2058_v45 = vpop.permute.xlu1 %2057 }
 0x4ec   :  { %v2060_v46 = vunpack.i.h.bf16 %v2058_v45  ;;  %v2059_v21 = vunpack.i.l.bf16 %v2058_v45  ;;  %v774_v45 = vperm.slane %v2302_v60, 2 }
 0x4ee   :  { %v671_v50 = vsel %vm670_vm10, %v669_v49, %v2059_v21  ;;  %v687_v52 = vsel %vm670_vm10, %v686_v32, %v2060_v46 }
 0x4ef   :  { %v673_v53 = vsel %vm672_vm11, %v671_v50, %v2064_v48  ;;  %v688_v54 = vsel %vm672_vm11, %v687_v52, %v2065_v47  ;;  %v777_v50 = vperm.slane %v2302_v60, 3 }
 0x4f0   :  { %v689_v55 = vpack.c.bf16 %v688_v54, %v673_v53 }
 0x4f2   :  { %1887 = vmatmul.msk.bf16.vlgmr.msra.gmra.mxu1 %vm49_vm0, %v689_v55 }
 0x56f   :  { %v719_v9 = vpop.f32.mrf.mxu1 }
 0x570   :  { %v720_v63 = vadd.f32 %v719_v9, %v694_v61  ;;  %v2026_v9 = vld [vmem:[%s2798_s7 + $0x10] sm:$0xff] }
 0x572   :  { %v724_v1 = vadd.f32 %v720_v63, %v2292_v57  ;;  %v2025_v63 = vld [vmem:[%s2798_s7 + $0x8] sm:$0xff] }
 0x574   :  { %v726_v2 = vsel %vm49_vm0, %v724_v1, 0.0  ;;  %v734_v3 = vmul.f32 %v724_v1, %v724_v1 }
 0x575   :  { %727 = vadd.xlane.f32.xlu0 %v726_v2 }
 0x576   :  { %v736_v4 = vsel %vm49_vm0, %v734_v3, 0.0  ;;  %v2024_v3 = vld [vmem:[%s2798_s7] sm:$0xff] }
 0x577   :  { %v721_v0 = vpop.f32.mrf.mxu1  ;;  %737 = vadd.xlane.f32.xlu2 %v736_v4 }
 0x578   :  { %v722_v7 = vadd.f32 %v721_v0, %v694_v61  ;;  %v2027_v61 = vld [vmem:[%s2798_s7 + $0x18] sm:$0xff] }
 0x579   :  { %875 = vmatpush.bf16.msra.mxu3 %v2027_v61 }
 0x57a   :  { %v725_v12 = vadd.f32 %v722_v7, %v2294_v58  ;;  %v2022_v58 = vld [vmem:[%s2797_s6] sm:$0xff] }
 0x57b   :  { %808 = vmatpush.bf16.msra.mxu2 %v2022_v58 }
 0x57c   :  { %v729_v62 = vsel %vm49_vm0, %v725_v12, 0.0  ;;  %v735_v14 = vmul.f32 %v725_v12, %v725_v12 }
 0x57d   :  { %730 = vadd.xlane.f32.xlu1 %v729_v62  ;;  %876 = vmatpush.bf16.msra.mxu3 %v2026_v9 }
 0x57e   :  { %v739_v15 = vsel %vm49_vm0, %v735_v14, 0.0 }
 0x57f   :  { %740 = vadd.xlane.f32.xlu0 %v739_v15 }
 0x581   :  { %877 = vmatpush.bf16.msra.mxu3 %v2025_v63 }
 0x585   :  { %878 = vmatpush.bf16.msra.mxu3 %v2024_v3 }
 0x5e8   :  { %v728_v19 = vpop.xlane.xlu0 %727 }
 0x5e9   :  { %v732_v57 = vmul.f32 %v728_v19, %v2273_v18 }
 0x5ea   :  { %v738_v20 = vpop.xlane.xlu2 %737 }
 0x5eb   :  { %v744_v22 = vmul.f32 %v732_v57, %v732_v57  ;;  %v742_v24 = vmul.f32 %v738_v20, %v2273_v18  ;;  %v748_v29 = vsub.f32 %v724_v1, %v732_v57  ;;  %v785_v1 = vperm.slane %v2302_v60, 4 }
 0x5ed   :  { %v746_v30 = vsub.f32 %v742_v24, %v744_v22 }
 0x5ef   :  { %v750_v5 = vadd.f32 1e-05, %v746_v30 }
 0x5f0   :  { %v731_v31 = vpop.xlane.xlu1 %730 }
 0x5f1   :  { %2131 = vrsqrt.f32 %v750_v5  ;;  %v733_v28 = vmul.f32 %v731_v31, %v2273_v18  ;;  %vm758_vm13 = vweird.f32 %v750_v5 }
 0x5f2   :  { %v741_v8 = vpop.xlane.xlu0 %740 }
 0x5f3   :  { %v745_v33 = vmul.f32 %v733_v28, %v733_v28  ;;  %v743_v23 = vmul.f32 %v741_v8, %v2273_v18  ;;  %v749_v47 = vsub.f32 %v725_v12, %v733_v28 }
 0x5f5   :  { %v747_v34 = vsub.f32 %v743_v23, %v745_v33 }
 0x5f7   :  { %v2132_v16 = vpop.eup %2131  ;;  %v751_v10 = vadd.f32 1e-05, %v747_v34 }
 0x5f8   :  { %v753_v35 = vmul.f32 %v2132_v16, %v750_v5  ;;  %vm759_vm12 = vweird.f32 %v2132_v16 }
 0x5f9   :  { %2133 = vrsqrt.f32 %v751_v10  ;;  %vm760_vm14 = vmor %vm758_vm13, %vm759_vm12  ;;  %vm768_vm1 = vweird.f32 %v751_v10 }
 0x5fa   :  { %v754_v36 = vmul.f32 %v2132_v16, %v753_v35 }
 0x5fc   :  { %v755_v37 = vmul.f32 0.5, %v754_v36 }
 0x5fe   :  { %v756_v38 = vsub.f32 1.5, %v755_v37 }
 0x5ff   :  { %v2134_v39 = vpop.eup %2133 }
 0x600   :  { %v757_v41 = vmul.f32 %v2132_v16, %v756_v38  ;;  %v763_v40 = vmul.f32 %v2134_v39, %v751_v10  ;;  %vm769_vm15 = vweird.f32 %v2134_v39 }
 0x601   :  { %vm770_vm2 = vmor %vm768_vm1, %vm769_vm15 }
 0x602   :  { %v764_v42 = vmul.f32 %v2134_v39, %v763_v40  ;;  %v761_v43 = vsel %vm760_vm14, %v2132_v16, %v757_v41  ;;  %v842_v16 = vperm.slane %v2302_v60, 5 }
 0x603   :  { %v772_v46 = vmul.f32 %v761_v43, %v748_v29 }
 0x604   :  { %v765_v44 = vmul.f32 0.5, %v764_v42 }
 0x605   :  { %v775_v32 = vmul.f32 %v774_v45, %v772_v46 }
 0x606   :  { %v766_v13 = vsub.f32 1.5, %v765_v44 }
 0x607   :  { %v778_v53 = vadd.f32 %v777_v50, %v775_v32 }
 0x608   :  { %v767_v21 = vmul.f32 %v2134_v39, %v766_v13 }
 0x60a   :  { %v771_v48 = vsel %vm770_vm2, %v2134_v39, %v767_v21 }
 0x60b   :  { %v773_v49 = vmul.f32 %v771_v48, %v749_v47 }
 0x60d   :  { %v776_v52 = vmul.f32 %v774_v45, %v773_v49 }
 0x60f   :  { %v779_v54 = vadd.f32 %v777_v50, %v776_v52  ;;  %v2029_v50 = vld [vmem:[%s2793_s4 + $0x18] sm:$0xff]  ;;  %v2028_v52 = vld [vmem:[%s2793_s4 + $0x10] sm:$0xff] }
 0x610   :  { %971 = vmatpush.bf16.msrb.mxu0 %v2029_v50 }
 0x611   :  { %v780_v55 = vpack.c.bf16 %v779_v54, %v778_v53 }
 0x613   :  { %1896 = vmatmul.msk.bf16.vlgmr.msra.gmra.mxu2 %vm49_vm0, %v780_v55 }
 0x614   :  { %972 = vmatpush.bf16.msrb.mxu0 %v2028_v52 }
 0x696   :  { %v810_v2 = vpop.f32.mrf.mxu2 }
 0x697   :  { %v811_v4 = vadd.f32 %v810_v2, %v785_v1 }
 0x699   :  { %v815_v0 = vmul.f32 %v811_v4, %v811_v4 }
 0x69b   :  { %v817_v7 = vmul.f32 %v815_v0, %v811_v4 }
 0x69d   :  { %v819_v12 = vmul.f32 0.044715, %v817_v7 }
 0x69e   :  { %v812_v62 = vpop.f32.mrf.mxu2 }
 0x69f   :  { %v821_v14 = vadd.f32 %v819_v12, %v811_v4  ;;  %v813_v15 = vadd.f32 %v812_v62, %v785_v1 }
 0x6a1   :  { %v823_v19 = vmul.f32 0.7978846, %v821_v14  ;;  %v816_v57 = vmul.f32 %v813_v15, %v813_v15 }
 0x6a3   :  { %v818_v20 = vmul.f32 %v816_v57, %v813_v15  ;;  %2135 = vtanh.f32 %v823_v19 }
 0x6a5   :  { %v820_v22 = vmul.f32 0.044715, %v818_v20 }
 0x6a7   :  { %v822_v24 = vadd.f32 %v820_v22, %v813_v15  ;;  %v935_v22 = vperm.slane %v2302_v60, 6 }
 0x6a9   :  { %v824_v26 = vmul.f32 0.7978846, %v822_v24  ;;  %v2136_v30 = vpop.eup %2135 }
 0x6aa   :  { %v827_v58 = vadd.f32 1.0, %v2136_v30 }
 0x6ab   :  { %2137 = vtanh.f32 %v824_v26 }
 0x6ac   :  { %v829_v31 = vmul.f32 0.5, %v827_v58 }
 0x6ae   :  { %v831_v33 = vmul.f32 %v829_v31, %v811_v4 }
 0x6b1   :  { %v2138_v5 = vpop.eup %2137 }
 0x6b2   :  { %v828_v28 = vadd.f32 1.0, %v2138_v5 }
 0x6b4   :  { %v830_v8 = vmul.f32 0.5, %v828_v28  ;;  %v938_v28 = vperm.slane %v2302_v60, 7 }
 0x6b6   :  { %v832_v23 = vmul.f32 %v830_v8, %v813_v15 }
 0x6b8   :  { %v833_v34 = vpack.c.bf16 %v832_v23, %v831_v33 }
 0x6ba   :  { %1913 = vmatmul.msk.bf16.vlgmr.msra.gmra.mxu3 %vm867_vm3, %v833_v34 }
 0x73d   :  { %v880_v10 = vpop.f32.mrf.mxu3 }
 0x73e   :  { %v881_v35 = vadd.f32 %v880_v10, %v842_v16 }
 0x740   :  { %v885_v36 = vadd.f32 %v881_v35, %v778_v53 }
 0x742   :  { %v887_v37 = vsel %vm49_vm0, %v885_v36, 0.0  ;;  %v895_v38 = vmul.f32 %v885_v36, %v885_v36 }
 0x743   :  { %888 = vadd.xlane.f32.xlu0 %v887_v37 }
 0x744   :  { %v897_v40 = vsel %vm49_vm0, %v895_v38, 0.0 }
 0x745   :  { %v882_v39 = vpop.f32.mrf.mxu3 }
 0x746   :  { %v883_v41 = vadd.f32 %v882_v39, %v842_v16  ;;  %v2564_v16 = vld [vmem:[%s2794_s3 + $0x8] sm:$0xff] }
 0x747   :  { %v949_v10 = vperm.slane %v2564_v16, 0 }
 0x748   :  { %v886_v42 = vadd.f32 %v883_v41, %v779_v54 }
 0x74a   :  { %v890_v43 = vsel %vm49_vm0, %v886_v42, 0.0  ;;  %v896_v44 = vmul.f32 %v886_v42, %v886_v42 }
 0x74b   :  { %898 = vadd.xlane.f32.xlu0 %v897_v40 }
 0x74c   :  { %v900_v29 = vsel %vm49_vm0, %v896_v44, 0.0 }
 0x753   :  { %891 = vadd.xlane.f32.xlu0 %v890_v43 }
 0x75b   :  { %901 = vadd.xlane.f32.xlu0 %v900_v29 }
 0x7b6   :  { %v889_v13 = vpop.xlane.xlu0 %888 }
 0x7b7   :  { %v893_v45 = vmul.f32 %v889_v13, %v2273_v18 }
 0x7b9   :  { %v905_v21 = vmul.f32 %v893_v45, %v893_v45  ;;  %v909_v57 = vsub.f32 %v885_v36, %v893_v45 }
 0x7be   :  { %v899_v46 = vpop.xlane.xlu0 %898 }
 0x7bf   :  { %v903_v47 = vmul.f32 %v899_v46, %v2273_v18 }
 0x7c1   :  { %v907_v48 = vsub.f32 %v903_v47, %v905_v21 }
 0x7c3   :  { %v911_v32 = vadd.f32 1e-05, %v907_v48 }
 0x7c5   :  { %2139 = vrsqrt.f32 %v911_v32  ;;  %vm919_vm5 = vweird.f32 %v911_v32 }
 0x7c6   :  { %v892_v49 = vpop.xlane.xlu0 %891 }
 0x7c7   :  { %v894_v54 = vmul.f32 %v892_v49, %v2273_v18 }
 0x7c9   :  { %v906_v9 = vmul.f32 %v894_v54, %v894_v54  ;;  %v910_v30 = vsub.f32 %v886_v42, %v894_v54 }
 0x7cb   :  { %v2140_v53 = vpop.eup %2139 }
 0x7cc   :  { %v914_v55 = vmul.f32 %v2140_v53, %v911_v32  ;;  %vm920_vm4 = vweird.f32 %v2140_v53 }
 0x7cd   :  { %vm921_vm6 = vmor %vm919_vm5, %vm920_vm4 }
 0x7ce   :  { %v902_v61 = vpop.xlane.xlu0 %901  ;;  %v915_v1 = vmul.f32 %v2140_v53, %v914_v55 }
 0x7cf   :  { %v904_v63 = vmul.f32 %v902_v61, %v2273_v18 }
 0x7d0   :  { %v916_v4 = vmul.f32 0.5, %v915_v1 }
 0x7d1   :  { %v908_v2 = vsub.f32 %v904_v63, %v906_v9 }
 0x7d2   :  { %v917_v0 = vsub.f32 1.5, %v916_v4 }
 0x7d3   :  { %v912_v3 = vadd.f32 1e-05, %v908_v2 }
 0x7d4   :  { %v918_v12 = vmul.f32 %v2140_v53, %v917_v0 }
 0x7d5   :  { %2141 = vrsqrt.f32 %v912_v3  ;;  %vm929_vm12 = vweird.f32 %v912_v3 }
 0x7d6   :  { %v922_v15 = vsel %vm921_vm6, %v2140_v53, %v918_v12 }
 0x7d7   :  { %v933_v24 = vmul.f32 %v922_v15, %v909_v57 }
 0x7d9   :  { %v936_v5 = vmul.f32 %v935_v22, %v933_v24 }
 0x7db   :  { %v2142_v7 = vpop.eup %2141  ;;  %v2554_v33 = vadd.f32 %v938_v28, %v936_v5 }
 0x7dc   :  { %v924_v62 = vmul.f32 %v2142_v7, %v912_v3  ;;  %vm930_vm7 = vweird.f32 %v2142_v7 }
 0x7dd   :  { %vm931_vm13 = vmor %vm929_vm12, %vm930_vm7  ;;  %vm1752_vm7 = vcmask 1040384  }
 0x7de   :  { %v925_v14 = vmul.f32 %v2142_v7, %v924_v62 }
 0x7e0   :  { %v926_v19 = vmul.f32 0.5, %v925_v14 }
 0x7e2   :  { %v927_v20 = vsub.f32 1.5, %v926_v19 }
 0x7e4   :  { %v928_v26 = vmul.f32 %v2142_v7, %v927_v20 }
 0x7e6   :  { %v932_v58 = vsel %vm931_vm13, %v2142_v7, %v928_v26 }
 0x7e7   :  { %v934_v31 = vmul.f32 %v932_v58, %v910_v30 }
 0x7e9   :  { %v937_v8 = vmul.f32 %v935_v22, %v934_v31 }
 0x7eb   :  { %v2556_v23 = vadd.f32 %v938_v28, %v937_v8 }
 0x7ed   :  { %v943_v34 = vpack.c.bf16 %v2556_v23, %v2554_v33 }
 0x7ef   :  { %1927 = vmatmul.msk.bf16.vlgmr.msrb.gmra.mxu0 %vm49_vm0, %v943_v34 }
 0x86c   :  { %v974_v35 = vpop.f32.mrf.mxu0 }
 0x86d   :  { %v975_v36 = vadd.f32 %v974_v35, %v949_v10 }
 0x86f   :  { %986 = vrot.lane.b32.xlu0 %v975_v36, %s2194_s26  ;;  %983 = vrot.lane.b32.xlu2 %v975_v36, %s2196_s28  ;;  %v999_v2 = vpack.c.bf16 %v975_v36, %v975_v36 }
 0x870   :  { %980 = vrot.lane.b32.xlu1 %v975_v36, %s2195_s27 }
 0x871   :  { %v1008_v4 = vunpack.c.l.b16 %v999_v2 }
 0x873   :  { %v2599_v7 = vpack.c.b16 %v1008_v4, %v1008_v4 }
 0x874   :  { %v976_v60 = vpop.f32.mrf.mxu0 }
 0x875   :  { %v977_v37 = vadd.f32 %v976_v60, %v949_v10 }
 0x877   :  { %990 = vrot.lane.b32.xlu0 %v977_v37, %s2195_s27  ;;  %996 = vrot.lane.b32.xlu2 %v977_v37, %s2194_s26  ;;  %v1003_v1 = vpack.c.bf16 %v977_v37, %v977_v37 }
 0x878   :  { %993 = vrot.lane.b32.xlu1 %v977_v37, %s2196_s28 }
 0x879   :  { %v1104_v3 = vunpack.c.l.b16 %v1003_v1 }
 0x87b   :  { %v2597_v0 = vpack.c.b16 %v1104_v3, %v1104_v3 }
 0x8c9   :  { %v984_v38 = vpop.permute.xlu2 %983 }
 0x8ca   :  { %v1001_v39 = vpack.c.bf16 %v984_v38, %v984_v38 }
 0x8cc   :  { %v1056_v41 = vunpack.c.l.b16 %v1001_v39 }
 0x8ce   :  { %v2573_v40 = vpack.c.b16 %v1056_v41, %v1056_v41 }
 0x8d0   :  { %1058 = vrot.lane.b32.xlu1 %v2573_v40, %s2197_s29 }
 0x8d1   :  { %v997_v29 = vpop.permute.xlu2 %996 }
 0x8d2   :  { %v1006_v21 = vpack.c.bf16 %v997_v29, %v997_v29 }
 0x8d4   :  { %v1176_v49 = vunpack.c.l.b16 %v1006_v21 }
 0x8d6   :  { %v2585_v61 = vpack.c.b16 %v1176_v49, %v1176_v49 }
 0x8e1   :  { %v987_v42 = vpop.permute.xlu0 %986 }
 0x8e2   :  { %v1002_v43 = vpack.c.bf16 %v987_v42, %v987_v42  ;;  %v981_v44 = vpop.permute.xlu1 %980 }
 0x8e3   :  { %v1000_v13 = vpack.c.bf16 %v981_v44, %v981_v44 }
 0x8e4   :  { %v1080_v45 = vunpack.c.l.b16 %v1002_v43 }
 0x8e5   :  { %v1032_v46 = vunpack.c.l.b16 %v1000_v13 }
 0x8e6   :  { %v2577_v47 = vpack.c.b16 %v1080_v45, %v1080_v45 }
 0x8e7   :  { %v2579_v48 = vpack.c.b16 %v1032_v46, %v1032_v46 }
 0x8e8   :  { %1082 = vrot.lane.b32.xlu2 %v2577_v47, %s2197_s29 }
 0x8e9   :  { %1034 = vrot.lane.b32.xlu0 %v2579_v48, %s2197_s29  ;;  %v991_v32 = vpop.permute.xlu0 %990 }
 0x8ea   :  { %v1004_v50 = vpack.c.bf16 %v991_v32, %v991_v32  ;;  %v994_v52 = vpop.permute.xlu1 %993 }
 0x8eb   :  { %v1005_v53 = vpack.c.bf16 %v994_v52, %v994_v52 }
 0x8ec   :  { %v1128_v54 = vunpack.c.l.b16 %v1004_v50 }
 0x8ed   :  { %v1152_v55 = vunpack.c.l.b16 %v1005_v53 }
 0x8ee   :  { %v2587_v9 = vpack.c.b16 %v1128_v54, %v1128_v54 }
 0x8ef   :  { %v2589_v63 = vpack.c.b16 %v1152_v55, %v1152_v55 }
 0x8f0   :  { %1178 = vrot.lane.b32.xlu2 %v2585_v61, %s2197_s29 }
 0x8f1   :  { %1130 = vrot.lane.b32.xlu0 %v2587_v9, %s2197_s29  ;;  %1154 = vrot.lane.b32.xlu1 %v2589_v63, %s2197_s29 }
 0x8f9   :  { %1106 = vrot.lane.b32.xlu1 %v2597_v0, %s2197_s29  ;;  %1010 = vrot.lane.b32.xlu0 %v2599_v7, %s2197_s29 }
 0x942   :  { %v1083_v12 = vpop.permute.xlu2 %1082  ;;  %v1059_v62 = vpop.permute.xlu1 %1058 }
 0x943   :  { %v1088_v14 = vsel %vm204_vm8, %v1083_v12, 0  ;;  %v1064_v15 = vsel %vm204_vm8, %v1059_v62, 0 }
 0x944   :  { %1073 = vmatpush.bf16.xpose.msrb.mxu3 %v1064_v15  ;;  %1097 = vmatpush.bf16.xpose.msra.mxu0 %v1088_v14 }
 0x94a   :  { %v1179_v19 = vpop.permute.xlu2 %1178 }
 0x94b   :  { %v1184_v57 = vsel %vm204_vm8, %v1179_v19, 0  ;;  %1930 = vmatmul.msk.bf16.vlgmr.msrb.gmra.mxu3 %vm204_vm8, %v1001_v39  ;;  %1931 = vmatmul.msk.bf16.vlgmr.msra.gmra.mxu0 %vm204_vm8, %v1002_v43 }
 0x94c   :  { %1193 = vmatpush.bf16.xpose.msrb.mxu0 %v1184_v57 }
 0x95b   :  { %v1035_v20 = vpop.permute.xlu0 %1034  ;;  %1935 = vmatmul.msk.bf16.vlgmr.msrb.gmra.mxu0 %vm204_vm8, %v1006_v21 }
 0x95c   :  { %v1040_v22 = vsel %vm204_vm8, %v1035_v20, 0 }
 0x95d   :  { %1049 = vmatpush.bf16.xpose.msrb.mxu2 %v1040_v22 }
 0x963   :  { %v1131_v24 = vpop.permute.xlu0 %1130  ;;  %v1155_v26 = vpop.permute.xlu1 %1154 }
 0x964   :  { %v1136_v30 = vsel %vm204_vm8, %v1131_v24, 0  ;;  %v1160_v58 = vsel %vm204_vm8, %v1155_v26, 0  ;;  %1929 = vmatmul.msk.bf16.vlgmr.msrb.gmra.mxu2 %vm204_vm8, %v1000_v13 }
 0x965   :  { %1145 = vmatpush.bf16.xpose.msra.mxu2 %v1136_v30  ;;  %1169 = vmatpush.bf16.xpose.msra.mxu3 %v1160_v58 }
 0x96b   :  { %v1107_v5 = vpop.permute.xlu1 %1106  ;;  %v1011_v31 = vpop.permute.xlu0 %1010 }
 0x96c   :  { %v1112_v28 = vsel %vm204_vm8, %v1107_v5, 0  ;;  %v1016_v8 = vsel %vm204_vm8, %v1011_v31, 0  ;;  %1934 = vmatmul.msk.bf16.vlgmr.msra.gmra.mxu3 %vm204_vm8, %v1005_v53 }
 0x96d   :  { %1025 = vmatpush.bf16.xpose.msrb.mxu1 %v1016_v8 }
 0x974   :  { %1928 = vmatmul.msk.bf16.vlgmr.msrb.gmra.mxu1 %vm204_vm8, %v999_v2  ;;  %1933 = vmatmul.msk.bf16.vlgmr.msra.gmra.mxu2 %vm204_vm8, %v1004_v50 }
 0x975   :  { %1121 = vmatpush.bf16.xpose.msra.mxu1 %v1112_v28 }
 0x984   :  { %1932 = vmatmul.msk.bf16.vlgmr.msra.gmra.mxu1 %vm204_vm8, %v1003_v1 }
 0x9c8   :  { %v1099_v34 = vpop.f32.mrf.mxu0 }
 0x9c9   :  { %v1100_v10 = vadd.f32 %v2362_v51, %v1099_v34 }
 0x9cb   :  { %v1208_v35 = vsel %vm204_vm8, %v1100_v10, -inf }
 0x9cc   :  { %1209 = vmax.xlane.f32.xlu1 %v1208_v35 }
 0x9ce   :  { %v1075_v36 = vpop.f32.mrf.mxu3 }
 0x9cf   :  { %v1076_v60 = vadd.f32 %v2369_v56, %v1075_v36 }
 0x9d0   :  { %v1101_v37 = vpop.f32.mrf.mxu0 }
 0x9d1   :  { %v1205_v38 = vsel %vm204_vm8, %v1076_v60, -inf }
 0x9d2   :  { %1206 = vmax.xlane.f32.xlu0 %v1205_v38 }
 0x9d6   :  { %v1077_v39 = vpop.f32.mrf.mxu3 }
 0x9d8   :  { %v1195_v41 = vpop.f32.mrf.mxu0 }
 0x9d9   :  { %v1196_v42 = vadd.f32 %v2374_v59, %v1195_v41 }
 0x9db   :  { %v1220_v43 = vsel %vm204_vm8, %v1196_v42, -inf }
 0x9dc   :  { %1221 = vmax.xlane.f32.xlu1 %v1220_v43 }
 0x9e0   :  { %v1197_v44 = vpop.f32.mrf.mxu0 }
 0x9e7   :  { %v1051_v29 = vpop.f32.mrf.mxu2 }
 0x9e8   :  { %v1052_v50 = vadd.f32 %v2404_v17, %v1051_v29 }
 0x9ef   :  { %v1053_v51 = vpop.f32.mrf.mxu2  ;;  %v1171_v13 = vpop.f32.mrf.mxu3 }
 0x9f0   :  { %v2628_v45 = vadd.f32 %v2386_v6, %v1171_v13  ;;  %v1202_v6 = vsel %vm204_vm8, %v1052_v50, -inf }
 0x9f1   :  { %v1027_v46 = vpop.f32.mrf.mxu1 }
 0x9f2   :  { %v2631_v56 = vadd.f32 %v2396_v11, %v1027_v46  ;;  %v1217_v21 = vsel %vm204_vm8, %v2628_v45, -inf }
 0x9f3   :  { %1218 = vmax.xlane.f32.xlu0 %v1217_v21 }
 0x9f4   :  { %v1199_v59 = vsel %vm204_vm8, %v2631_v56, -inf }
 0x9f5   :  { %1200 = vmax.xlane.f32.xlu2 %v1199_v59 }
 0x9f7   :  { %v1147_v32 = vpop.f32.mrf.mxu2  ;;  %v1173_v49 = vpop.f32.mrf.mxu3 }
 0x9f8   :  { %v1148_v11 = vadd.f32 %v2412_v25, %v1147_v32 }
 0x9f9   :  { %v1029_v52 = vpop.f32.mrf.mxu1 }
 0x9fa   :  { %v1214_v2 = vsel %vm204_vm8, %v1148_v11, -inf }
 0x9fd   :  { %1203 = vmax.xlane.f32.xlu2 %v1202_v6 }
 0x9ff   :  { %v1149_v53 = vpop.f32.mrf.mxu2 }
 0xa01   :  { %v1123_v54 = vpop.f32.mrf.mxu1 }
 0xa02   :  { %v1124_v55 = vadd.f32 %v2418_v27, %v1123_v54 }
 0xa04   :  { %v1211_v1 = vsel %vm204_vm8, %v1124_v55, -inf }
 0xa05   :  { %1212 = vmax.xlane.f32.xlu1 %v1211_v1  ;;  %1215 = vmax.xlane.f32.xlu2 %v1214_v2 }
 0xa09   :  { %v1125_v3 = vpop.f32.mrf.mxu1 }
 0xa1e   :  { %1358 = vrot.lane.b32.xlu1 %v2577_v47, %s2198_s24 }
 0xa3f   :  { %v1210_v17 = vpop.xlane.xlu1 %1209 }
 0xa40   :  { %v1226_v4 = vsub.f32 %v1100_v10, %v1210_v17 }
 0xa42   :  { %v1237_v12 = vmul.f32 1.442695, %v1226_v4 }
 0xa44   :  { %2143 = vpow2.f32 %v1237_v12 }
 0xa45   :  { %v1207_v62 = vpop.xlane.xlu0 %1206 }
 0xa46   :  { %v1225_v14 = vsub.f32 %v1076_v60, %v1207_v62 }
 0xa48   :  { %v1235_v25 = vmul.f32 1.442695, %v1225_v14 }
 0xa4a   :  { %v2645_v15 = vpop.eup %2143  ;;  %2145 = vpow2.f32 %v1235_v25 }
 0xa4b   :  { %v1256_v27 = vsel %vm204_vm8, %v2645_v15, 0.0 }
 0xa4c   :  { %1257 = vadd.xlane.f32.xlu2 %v1256_v27 }
 0xa4f   :  { %v1222_v26 = vpop.xlane.xlu1 %1221 }
 0xa50   :  { %v2649_v19 = vpop.eup %2145  ;;  %v1230_v31 = vsub.f32 %v1196_v42, %v1222_v26 }
 0xa51   :  { %v1253_v57 = vsel %vm204_vm8, %v2649_v19, 0.0 }
 0xa52   :  { %1254 = vadd.xlane.f32.xlu1 %v1253_v57  ;;  %v1245_v34 = vmul.f32 1.442695, %v1230_v31 }
 0xa64   :  { %1337 = vrot.lane.b32.xlu2 %v2573_v40, %s2198_s24 }
 0xa66   :  { %v1219_v44 = vpop.xlane.xlu0 %1218 }
 0xa67   :  { %v1229_v29 = vsub.f32 %v2628_v45, %v1219_v44 }
 0xa68   :  { %v1201_v47 = vpop.xlane.xlu2 %1200 }
 0xa69   :  { %v1243_v51 = vmul.f32 1.442695, %v1229_v29 }
 0xa70   :  { %v1204_v20 = vpop.xlane.xlu2 %1203 }
 0xa71   :  { %v1224_v22 = vsub.f32 %v1052_v50, %v1204_v20 }
 0xa73   :  { %v1233_v24 = vmul.f32 1.442695, %v1224_v22 }
 0xa75   :  { %2147 = vpow2.f32 %v1233_v24 }
 0xa78   :  { %v1216_v30 = vpop.xlane.xlu2 %1215  ;;  %v1213_v10 = vpop.xlane.xlu1 %1212 }
 0xa79   :  { %v1228_v58 = vsub.f32 %v1148_v11, %v1216_v30  ;;  %v1227_v35 = vsub.f32 %v1124_v55, %v1213_v10 }
 0xa7b   :  { %v2148_v5 = vpop.eup %2147  ;;  %v1241_v28 = vmul.f32 1.442695, %v1228_v58  ;;  %v1239_v60 = vmul.f32 1.442695, %v1227_v35 }
 0xa7c   :  { %v1250_v8 = vsel %vm204_vm8, %v2148_v5, 0.0 }
 0xa7d   :  { %1251 = vadd.xlane.f32.xlu0 %v1250_v8  ;;  %2149 = vpow2.f32 %v1241_v28 }
 0xa7e   :  { %2151 = vpow2.f32 %v1245_v34 }
 0xa7f   :  { %2153 = vpow2.f32 %v1239_v60 }
 0xa80   :  { %2155 = vpow2.f32 %v1243_v51 }
 0xa83   :  { %v2150_v40 = vpop.eup %2149 }
 0xa84   :  { %v1262_v36 = vsel %vm204_vm8, %v2150_v40, 0.0  ;;  %v2657_v37 = vpop.eup %2151 }
 0xa85   :  { %1263 = vadd.xlane.f32.xlu1 %v1262_v36  ;;  %v1268_v38 = vsel %vm204_vm8, %v2657_v37, 0.0  ;;  %v2661_v41 = vpop.eup %2153 }
 0xa86   :  { %v1259_v43 = vsel %vm204_vm8, %v2661_v41, 0.0  ;;  %v2156_v46 = vpop.eup %2155 }
 0xa8d   :  { %1269 = vadd.xlane.f32.xlu2 %v1268_v38 }
 0xa90   :  { %v1359_v39 = vpop.permute.xlu1 %1358 }
 0xa91   :  { %v1364_v42 = vsel %vm493_vm9, %v1359_v39, 0  ;;  %1316 = vrot.lane.b32.xlu0 %v2579_v48, %s2198_s24  ;;  %v1223_v48 = vsub.f32 %v2631_v56, %v1201_v47 }
 0xa92   :  { %1373 = vmatpush.bf16.msra.mxu0 %v1364_v42 }
 0xa93   :  { %v1231_v13 = vmul.f32 1.442695, %v1223_v48 }
 0xa95   :  { %1260 = vadd.xlane.f32.xlu2 %v1259_v43  ;;  %2157 = vpow2.f32 %v1231_v13 }
 0xa9b   :  { %v2158_v21 = vpop.eup %2157 }
 0xa9c   :  { %v1247_v45 = vsel %vm204_vm8, %v2158_v21, 0.0 }
 0xa9e   :  { %1400 = vrot.lane.b32.xlu1 %v2587_v9, %s2198_s24  ;;  %v1265_v9 = vsel %vm204_vm8, %v2156_v46, 0.0 }
 0xaa6   :  { %1421 = vrot.lane.b32.xlu1 %v2589_v63, %s2198_s24 }
 0xaae   :  { %1442 = vrot.lane.b32.xlu1 %v2585_v61, %s2198_s24 }
 0xab6   :  { %1295 = vrot.lane.b32.xlu1 %v2599_v7, %s2198_s24 }
 0xabb   :  { %1266 = vadd.xlane.f32.xlu0 %v1265_v9 }
 0xabf   :  { %v1258_v63 = vpop.xlane.xlu2 %1257 }
 0xac0   :  { %2159 = vrcp.f32 %v1258_v63 }
 0xac3   :  { %1248 = vadd.xlane.f32.xlu0 %v1247_v45 }
 0xac5   :  { %v1255_v59 = vpop.xlane.xlu1 %1254 }
 0xac6   :  { %v2160_v61 = vpop.eup %2159  ;;  %2161 = vrcp.f32 %v1255_v59 }
 0xac7   :  { %v1282_v56 = vmul.f32 %v2160_v61, %v2645_v15  ;;  %v1338_v32 = vpop.permute.xlu2 %1337 }
 0xac8   :  { %v1343_v49 = vsel %vm493_vm9, %v1338_v32, 0 }
 0xac9   :  { %v1290_v50 = vpack.c.bf16 %v1282_v56, %v1282_v56  ;;  %1352 = vmatpush.bf16.msrb.mxu3 %v1343_v49  ;;  %v2031_v49 = vld [vmem:[%s2796_s5 + $0x18] sm:$0xff] }
 0xacb   :  { %1939 = vmatmul.msk.bf16.vlgmr.msra.gmra.mxu0 %vm204_vm8, %v1290_v50  ;;  %v2030_v50 = vld [vmem:[%s2796_s5 + $0x10] sm:$0xff] }
 0xacc   :  { %v2162_v7 = vpop.eup %2161 }
 0xacd   :  { %v1281_v52 = vmul.f32 %v2162_v7, %v2649_v19 }
 0xacf   :  { %v1289_v6 = vpack.c.bf16 %v1281_v52, %v1281_v52 }
 0xad1   :  { %1938 = vmatmul.msk.bf16.vlgmr.msrb.gmra.mxu3 %vm204_vm8, %v1289_v6 }
 0xad7   :  { %1379 = vrot.lane.b32.xlu0 %v2597_v0, %s2198_s24 }
 0xaf0   :  { %v1252_v53 = vpop.xlane.xlu0 %1251 }
 0xaf1   :  { %2163 = vrcp.f32 %v1252_v53 }
 0xaf7   :  { %v2164_v11 = vpop.eup %2163 }
 0xaf8   :  { %v1280_v54 = vmul.f32 %v2164_v11, %v2148_v5  ;;  %v1264_v3 = vpop.xlane.xlu1 %1263 }
 0xaf9   :  { %2165 = vrcp.f32 %v1264_v3 }
 0xafa   :  { %v1288_v2 = vpack.c.bf16 %v1280_v54, %v1280_v54 }
 0xaff   :  { %v2166_v17 = vpop.eup %2165 }
 0xb00   :  { %v1284_v12 = vmul.f32 %v2166_v17, %v2150_v40  ;;  %v1270_v0 = vpop.xlane.xlu2 %1269 }
 0xb01   :  { %2167 = vrcp.f32 %v1270_v0 }
 0xb02   :  { %v1292_v14 = vpack.c.bf16 %v1284_v12, %v1284_v12 }
 0xb03   :  { %v1317_v55 = vpop.permute.xlu0 %1316 }
 0xb04   :  { %v1322_v1 = vsel %vm493_vm9, %v1317_v55, 0 }
 0xb05   :  { %1331 = vmatpush.bf16.msrb.mxu2 %v1322_v1 }
 0xb07   :  { %v2168_v27 = vpop.eup %2167 }
 0xb08   :  { %1937 = vmatmul.msk.bf16.vlgmr.msrb.gmra.mxu2 %vm204_vm8, %v1288_v2  ;;  %v1286_v19 = vmul.f32 %v2168_v27, %v2657_v37  ;;  %v1261_v34 = vpop.xlane.xlu2 %1260 }
 0xb0a   :  { %v1294_v20 = vpack.c.bf16 %v1286_v19, %v1286_v19 }
 0xb10   :  { %v1401_v4 = vpop.permute.xlu1 %1400 }
 0xb11   :  { %v1406_v62 = vsel %vm493_vm9, %v1401_v4, 0 }
 0xb12   :  { %1415 = vmatpush.bf16.msra.mxu2 %v1406_v62 }
 0xb18   :  { %1941 = vmatmul.msk.bf16.vlgmr.msra.gmra.mxu2 %vm204_vm8, %v1292_v14  ;;  %v1422_v25 = vpop.permute.xlu1 %1421 }
 0xb19   :  { %v1427_v15 = vsel %vm493_vm9, %v1422_v25, 0  ;;  %v1499_v25 = vperm.slane %v2564_v16, 1 }
 0xb1a   :  { %1436 = vmatpush.bf16.msra.mxu3 %v1427_v15 }
 0xb20   :  { %v1443_v57 = vpop.permute.xlu1 %1442 }
 0xb21   :  { %v1448_v47 = vsel %vm493_vm9, %v1443_v57, 0 }
 0xb22   :  { %1457 = vmatpush.bf16.msrb.mxu0 %v1448_v47 }
 0xb25   :  { %1943 = vmatmul.msk.bf16.vlgmr.msrb.gmra.mxu0 %vm204_vm8, %v1294_v20 }
 0xb28   :  { %v1296_v22 = vpop.permute.xlu1 %1295 }
 0xb29   :  { %v1301_v24 = vsel %vm493_vm9, %v1296_v22, 0 }
 0xb2a   :  { %1310 = vmatpush.bf16.msrb.mxu1 %v1301_v24 }
 0xb2e   :  { %v1267_v26 = vpop.xlane.xlu0 %1266 }
 0xb2f   :  { %2169 = vrcp.f32 %v1267_v26 }
 0xb35   :  { %v2170_v30 = vpop.eup %2169 }
 0xb36   :  { %v1285_v58 = vmul.f32 %v2170_v30, %v2156_v46  ;;  %v1249_v5 = vpop.xlane.xlu0 %1248 }
 0xb37   :  { %2171 = vrcp.f32 %v1249_v5 }
 0xb38   :  { %v1293_v31 = vpack.c.bf16 %v1285_v58, %v1285_v58  ;;  %2173 = vrcp.f32 %v1261_v34 }
 0xb3a   :  { %1942 = vmatmul.msk.bf16.vlgmr.msra.gmra.mxu3 %vm204_vm8, %v1293_v31 }
 0xb3d   :  { %v2172_v28 = vpop.eup %2171 }
 0xb3e   :  { %v1279_v8 = vmul.f32 %v2172_v28, %v2158_v21  ;;  %v2174_v40 = vpop.eup %2173 }
 0xb3f   :  { %v1283_v37 = vmul.f32 %v2174_v40, %v2661_v41 }
 0xb40   :  { %v1287_v10 = vpack.c.bf16 %v1279_v8, %v1279_v8 }
 0xb41   :  { %v1291_v38 = vpack.c.bf16 %v1283_v37, %v1283_v37 }
 0xb42   :  { %1936 = vmatmul.msk.bf16.vlgmr.msrb.gmra.mxu1 %vm204_vm8, %v1287_v10  ;;  %v2033_v10 = vld [vmem:[%s2797_s6 + $0x18] sm:$0xff] }
 0xb43   :  { %1613 = vmatpush.bf16.msrb.mxu2 %v2033_v10 }
 0xb48   :  { %v1375_v35 = vpop.f32.mrf.mxu0 }
 0xb49   :  { %v1380_v36 = vpop.permute.xlu0 %1379 }
 0xb4a   :  { %v1385_v60 = vsel %vm493_vm9, %v1380_v36, 0 }
 0xb4b   :  { %1394 = vmatpush.bf16.msra.mxu1 %v1385_v60 }
 0xb4f   :  { %1521 = vmatpush.bf16.msrb.mxu1 %v2031_v49 }
 0xb50   :  { %v1377_v39 = vpop.f32.mrf.mxu0 }
 0xb52   :  { %1940 = vmatmul.msk.bf16.vlgmr.msra.gmra.mxu1 %vm204_vm8, %v1291_v38 }
 0xb53   :  { %1522 = vmatpush.bf16.msrb.mxu1 %v2030_v50 }
 0xb54   :  { %v1354_v42 = vpop.f32.mrf.mxu3 }
 0xb5c   :  { %v1356_v43 = vpop.f32.mrf.mxu3 }
 0xb8b   :  { %v1333_v44 = vpop.f32.mrf.mxu2 }
 0xb93   :  { %v1335_v29 = vpop.f32.mrf.mxu2 }
 0xb9b   :  { %v1417_v51 = vpop.f32.mrf.mxu2 }
 0xb9c   :  { %v2066_v48 = vpack.i.bf16 %v1417_v51, %v1333_v44 }
 0xb9e   :  { %2067 = vrot.lane.b32.xlu1 %v2066_v48, %s2200_s25 }
 0xba2   :  { %v1459_v13 = vpop.f32.mrf.mxu0 }
 0xba3   :  { %v1419_v46 = vpop.f32.mrf.mxu2  ;;  %v2076_v9 = vpack.i.bf16 %v1459_v13, %v1375_v35 }
 0xba6   :  { %2077 = vrot.lane.b32.xlu1 %v2076_v9, %s2199_s1 }
 0xbaa   :  { %v1461_v21 = vpop.f32.mrf.mxu0 }
 0xbbd   :  { %v1438_v63 = vpop.f32.mrf.mxu3 }
 0xbbe   :  { %v2071_v41 = vpack.i.bf16 %v1438_v63, %v1354_v42 }
 0xbbf   :  { %v1312_v45 = vpop.f32.mrf.mxu1 }
 0xbc0   :  { %2072 = vrot.lane.b32.xlu2 %v2071_v41, %s2201_s30 }
 0xbc5   :  { %v1440_v59 = vpop.f32.mrf.mxu3 }
 0xbc7   :  { %v1314_v61 = vpop.f32.mrf.mxu1 }
 0xbcf   :  { %v1396_v56 = vpop.f32.mrf.mxu1 }
 0xbd7   :  { %v1398_v32 = vpop.f32.mrf.mxu1 }
 0xc10   :  { %v2068_v7 = vpop.permute.xlu1 %2067 }
 0xc11   :  { %v2070_v52 = vunpack.i.h.bf16 %v2068_v7  ;;  %v2069_v6 = vunpack.i.l.bf16 %v2068_v7 }
 0xc13   :  { %v1475_v1 = vsel %vm204_vm8, %v1312_v45, %v2069_v6  ;;  %v1490_v2 = vsel %vm204_vm8, %v1396_v56, %v2070_v52  ;;  %v1579_v56 = vperm.slane %v2564_v16, 2 }
 0xc18   :  { %v2078_v53 = vpop.permute.xlu1 %2077 }
 0xc19   :  { %v2080_v3 = vunpack.i.h.bf16 %v2078_v53  ;;  %v2079_v17 = vunpack.i.l.bf16 %v2078_v53  ;;  %v1582_v53 = vperm.slane %v2564_v16, 3 }
 0xc1a   :  { %v2073_v11 = vpop.permute.xlu2 %2072 }
 0xc1b   :  { %v2075_v54 = vunpack.i.h.bf16 %v2073_v11  ;;  %v2074_v55 = vunpack.i.l.bf16 %v2073_v11 }
 0xc1d   :  { %v1476_v4 = vsel %vm670_vm10, %v1475_v1, %v2074_v55  ;;  %v1491_v12 = vsel %vm670_vm10, %v1490_v2, %v2075_v54  ;;  %v2037_v2 = vld [vmem:[%s2798_s7 + $0x38] sm:$0xff] }
 0xc1e   :  { %v1477_v62 = vsel %vm672_vm11, %v1476_v4, %v2079_v17  ;;  %v1492_v0 = vsel %vm672_vm11, %v1491_v12, %v2080_v3  ;;  %1681 = vmatpush.bf16.msrb.mxu3 %v2037_v2  ;;  %v2036_v3 = vld [vmem:[%s2798_s7 + $0x30] sm:$0xff]  ;;  %v2035_v17 = vld [vmem:[%s2798_s7 + $0x28] sm:$0xff]  ;;  %v1591_v4 = vperm.slane %v2564_v16, 4 }
 0xc1f   :  { %v1493_v14 = vpack.c.bf16 %v1492_v0, %v1477_v62  ;;  %v2034_v62 = vld [vmem:[%s2798_s7 + $0x20] sm:$0xff] }
 0xc21   :  { %1956 = vmatmul.msk.bf16.vlgmr.msrb.gmra.mxu1 %vm49_vm0, %v1493_v14 }
 0xc22   :  { %1682 = vmatpush.bf16.msrb.mxu3 %v2036_v3 }
 0xc26   :  { %1683 = vmatpush.bf16.msrb.mxu3 %v2035_v17 }
 0xc2a   :  { %1684 = vmatpush.bf16.msrb.mxu3 %v2034_v62  ;;  %v1741_v62 = vperm.slane %v2564_v16, 6 }
 0xc9e   :  { %v1524_v15 = vpop.f32.mrf.mxu1 }
 0xc9f   :  { %v1525_v27 = vadd.f32 %v1524_v15, %v1499_v25 }
 0xca1   :  { %v1529_v19 = vadd.f32 %v1525_v27, %v2554_v33 }
 0xca3   :  { %v1531_v57 = vsel %vm49_vm0, %v1529_v19, 0.0  ;;  %v1539_v47 = vmul.f32 %v1529_v19, %v1529_v19 }
 0xca4   :  { %1532 = vadd.xlane.f32.xlu0 %v1531_v57 }
 0xca5   :  { %v1541_v20 = vsel %vm49_vm0, %v1539_v47, 0.0 }
 0xca6   :  { %v1526_v22 = vpop.f32.mrf.mxu1  ;;  %1542 = vadd.xlane.f32.xlu2 %v1541_v20 }
 0xca7   :  { %v1527_v24 = vadd.f32 %v1526_v22, %v1499_v25 }
 0xca9   :  { %v1530_v26 = vadd.f32 %v1527_v24, %v2556_v23  ;;  %v2032_v23 = vld [vmem:[%s2797_s6 + $0x10] sm:$0xff] }
 0xcaa   :  { %1614 = vmatpush.bf16.msrb.mxu2 %v2032_v23  ;;  %v1649_v23 = vperm.slane %v2564_v16, 5 }
 0xcab   :  { %v1534_v30 = vsel %vm49_vm0, %v1530_v26, 0.0  ;;  %v1540_v58 = vmul.f32 %v1530_v26, %v1530_v26 }
 0xcac   :  { %1535 = vadd.xlane.f32.xlu1 %v1534_v30 }
 0xcad   :  { %v1544_v5 = vsel %vm49_vm0, %v1540_v58, 0.0 }
 0xcae   :  { %1545 = vadd.xlane.f32.xlu0 %v1544_v5 }
 0xd17   :  { %v1533_v31 = vpop.xlane.xlu0 %1532 }
 0xd18   :  { %v1537_v33 = vmul.f32 %v1533_v31, %v2273_v18 }
 0xd19   :  { %v1543_v28 = vpop.xlane.xlu2 %1542 }
 0xd1a   :  { %v1549_v8 = vmul.f32 %v1537_v33, %v1537_v33  ;;  %v1547_v34 = vmul.f32 %v1543_v28, %v2273_v18  ;;  %v1553_v59 = vsub.f32 %v1529_v19, %v1537_v33 }
 0xd1c   :  { %v1551_v35 = vsub.f32 %v1547_v34, %v1549_v8 }
 0xd1e   :  { %v1555_v40 = vadd.f32 1e-05, %v1551_v35 }
 0xd1f   :  { %v1536_v36 = vpop.xlane.xlu1 %1535 }
 0xd20   :  { %2175 = vrsqrt.f32 %v1555_v40  ;;  %v1538_v60 = vmul.f32 %v1536_v36, %v2273_v18  ;;  %vm1563_vm9 = vweird.f32 %v1555_v40 }
 0xd21   :  { %v1546_v37 = vpop.xlane.xlu0 %1545 }
 0xd22   :  { %v1550_v38 = vmul.f32 %v1538_v60, %v1538_v60  ;;  %v1548_v39 = vmul.f32 %v1546_v37, %v2273_v18  ;;  %v1554_v50 = vsub.f32 %v1530_v26, %v1538_v60 }
 0xd24   :  { %v1552_v42 = vsub.f32 %v1548_v39, %v1550_v38 }
 0xd26   :  { %v2176_v43 = vpop.eup %2175  ;;  %v1556_v44 = vadd.f32 1e-05, %v1552_v42 }
 0xd27   :  { %v1558_v29 = vmul.f32 %v2176_v43, %v1555_v40  ;;  %vm1564_vm8 = vweird.f32 %v2176_v43 }
 0xd28   :  { %2177 = vrsqrt.f32 %v1556_v44  ;;  %vm1565_vm10 = vmor %vm1563_vm9, %vm1564_vm8  ;;  %vm1573_vm14 = vweird.f32 %v1556_v44  ;;  %vm1846_vm9 = vcmask 1041408  }
 0xd29   :  { %v1559_v51 = vmul.f32 %v2176_v43, %v1558_v29 }
 0xd2b   :  { %v1560_v48 = vmul.f32 0.5, %v1559_v51 }
 0xd2d   :  { %v1561_v13 = vsub.f32 1.5, %v1560_v48 }
 0xd2e   :  { %v2178_v46 = vpop.eup %2177 }
 0xd2f   :  { %v1562_v9 = vmul.f32 %v2176_v43, %v1561_v13  ;;  %v1568_v21 = vmul.f32 %v2178_v46, %v1556_v44  ;;  %vm1574_vm11 = vweird.f32 %v2178_v46 }
 0xd30   :  { %vm1575_vm15 = vmor %vm1573_vm14, %vm1574_vm11 }
 0xd31   :  { %v1569_v63 = vmul.f32 %v2178_v46, %v1568_v21  ;;  %v1566_v41 = vsel %vm1565_vm10, %v2176_v43, %v1562_v9  ;;  %vm1848_vm10 = vcmask 257024  }
 0xd32   :  { %v1577_v32 = vmul.f32 %v1566_v41, %v1553_v59 }
 0xd33   :  { %v1570_v45 = vmul.f32 0.5, %v1569_v63  ;;  %v2039_v63 = vld [vmem:[%s2799_s8 + $0x8] sm:$0xff] }
 0xd34   :  { %v1580_v52 = vmul.f32 %v1579_v56, %v1577_v32  ;;  %1781 = vmatpush.bf16.msra.mxu0 %v2039_v63 }
 0xd35   :  { %v1571_v61 = vsub.f32 1.5, %v1570_v45 }
 0xd36   :  { %v1583_v54 = vadd.f32 %v1582_v53, %v1580_v52 }
 0xd37   :  { %v1572_v49 = vmul.f32 %v2178_v46, %v1571_v61 }
 0xd39   :  { %v1576_v7 = vsel %vm1575_vm15, %v2178_v46, %v1572_v49 }
 0xd3a   :  { %v1578_v6 = vmul.f32 %v1576_v7, %v1554_v50 }
 0xd3c   :  { %v1581_v11 = vmul.f32 %v1579_v56, %v1578_v6  ;;  %v2038_v56 = vld [vmem:[%s2799_s8] sm:$0xff] }
 0xd3d   :  { %1782 = vmatpush.bf16.msra.mxu0 %v2038_v56 }
 0xd3e   :  { %v1584_v55 = vadd.f32 %v1582_v53, %v1581_v11 }
 0xd40   :  { %v1585_v1 = vpack.c.bf16 %v1584_v55, %v1583_v54 }
 0xd42   :  { %1969 = vmatmul.msk.bf16.vlgmr.msrb.gmra.mxu2 %vm49_vm0, %v1585_v1 }
 0xdc5   :  { %v1616_v12 = vpop.f32.mrf.mxu2 }
 0xdc6   :  { %v1617_v0 = vadd.f32 %v1616_v12, %v1591_v4 }
 0xdc8   :  { %v1621_v14 = vmul.f32 %v1617_v0, %v1617_v0 }
 0xdca   :  { %v1623_v25 = vmul.f32 %v1621_v14, %v1617_v0 }
 0xdcc   :  { %v1625_v15 = vmul.f32 0.044715, %v1623_v25 }
 0xdcd   :  { %v1618_v27 = vpop.f32.mrf.mxu2 }
 0xdce   :  { %v1627_v19 = vadd.f32 %v1625_v15, %v1617_v0  ;;  %v1619_v57 = vadd.f32 %v1618_v27, %v1591_v4  ;;  %v1744_v15 = vperm.slane %v2564_v16, 7  ;;  %v2041_v16 = vld [vmem:[%s2799_s8 + $0x18] sm:$0xff] }
 0xdcf   :  { %1817 = vmatpush.bf16.msra.mxu1 %v2041_v16 }
 0xdd0   :  { %v1629_v47 = vmul.f32 0.7978846, %v1627_v19  ;;  %v1622_v20 = vmul.f32 %v1619_v57, %v1619_v57 }
 0xdd2   :  { %v1624_v22 = vmul.f32 %v1622_v20, %v1619_v57  ;;  %2179 = vtanh.f32 %v1629_v47 }
 0xdd4   :  { %v1626_v24 = vmul.f32 0.044715, %v1624_v22 }
 0xdd6   :  { %v1628_v26 = vadd.f32 %v1626_v24, %v1619_v57 }
 0xdd8   :  { %v1630_v30 = vmul.f32 0.7978846, %v1628_v26  ;;  %v2180_v58 = vpop.eup %2179 }
 0xdd9   :  { %v1633_v5 = vadd.f32 1.0, %v2180_v58 }
 0xdda   :  { %2181 = vtanh.f32 %v1630_v30 }
 0xddb   :  { %v1635_v33 = vmul.f32 0.5, %v1633_v5 }
 0xddd   :  { %v1637_v34 = vmul.f32 %v1635_v33, %v1617_v0  ;;  %v2091_v33 = vld [vmem:[%s2792_s2 + $0x12] ss:$0 sm:$0xff] }
 0xde0   :  { %v2182_v31 = vpop.eup %2181 }
 0xde1   :  { %v1634_v28 = vadd.f32 1.0, %v2182_v31  ;;  %v2040_v31 = vld [vmem:[%s2799_s8 + $0x10] sm:$0xff] }
 0xde2   :  { %1818 = vmatpush.bf16.msra.mxu1 %v2040_v31 }
 0xde3   :  { %v1636_v8 = vmul.f32 0.5, %v1634_v28 }
 0xde5   :  { %v1638_v10 = vmul.f32 %v1636_v8, %v1619_v57 }
 0xde7   :  { %v1639_v35 = vpack.c.bf16 %v1638_v10, %v1637_v34 }
 0xde9   :  { %1994 = vmatmul.msk.bf16.vlgmr.msrb.gmra.mxu3 %vm867_vm3, %v1639_v35 }
 0xe6c   :  { %v1686_v40 = vpop.f32.mrf.mxu3 }
 0xe6d   :  { %v1687_v36 = vadd.f32 %v1686_v40, %v1649_v23 }
 0xe6f   :  { %v2752_v60 = vadd.f32 %v1687_v36, %v1583_v54 }
 0xe71   :  { %v1693_v37 = vsel %vm49_vm0, %v2752_v60, 0.0  ;;  %v1701_v51 = vmul.f32 %v2752_v60, %v2752_v60 }
 0xe72   :  { %1694 = vadd.xlane.f32.xlu0 %v1693_v37 }
 0xe73   :  { %v1703_v48 = vsel %vm49_vm0, %v1701_v51, 0.0 }
 0xe74   :  { %v1688_v38 = vpop.f32.mrf.mxu3 }
 0xe75   :  { %v1689_v39 = vadd.f32 %v1688_v38, %v1649_v23  ;;  %v2092_v23 = vld [vmem:[%s2792_s2 + $0x13] ss:$0 sm:$0xff] }
 0xe77   :  { %v1692_v42 = vadd.f32 %v1689_v39, %v1584_v55 }
 0xe79   :  { %v1696_v43 = vsel %vm49_vm0, %v1692_v42, 0.0  ;;  %v1702_v44 = vmul.f32 %v1692_v42, %v1692_v42 }
 0xe7a   :  { %1697 = vadd.xlane.f32.xlu1 %v1696_v43 }
 0xe7b   :  { %v1706_v29 = vsel %vm49_vm0, %v1702_v44, 0.0 }
 0xe7c   :  { %1707 = vadd.xlane.f32.xlu2 %v1706_v29 }
 0xe82   :  { %1704 = vadd.xlane.f32.xlu1 %v1703_v48 }
 0xee5   :  { %v1695_v9 = vpop.xlane.xlu0 %1694 }
 0xee6   :  { %v1699_v59 = vmul.f32 %v1695_v9, %v2273_v18 }
 0xee8   :  { %v1711_v50 = vmul.f32 %v1699_v59, %v1699_v59  ;;  %v1715_v57 = vsub.f32 %v2752_v60, %v1699_v59 }
 0xeed   :  { %v1698_v13 = vpop.xlane.xlu1 %1697 }
 0xeee   :  { %v1700_v46 = vmul.f32 %v1698_v13, %v2273_v18 }
 0xeef   :  { %v1708_v21 = vpop.xlane.xlu2 %1707 }
 0xef0   :  { %v1712_v41 = vmul.f32 %v1700_v46, %v1700_v46  ;;  %v1710_v45 = vmul.f32 %v1708_v21, %v2273_v18  ;;  %v1716_v12 = vsub.f32 %v1692_v42, %v1700_v46 }
 0xef2   :  { %v1714_v61 = vsub.f32 %v1710_v45, %v1712_v41 }
 0xef4   :  { %v1718_v32 = vadd.f32 1e-05, %v1714_v61 }
 0xef5   :  { %v1705_v49 = vpop.xlane.xlu1 %1704 }
 0xef6   :  { %2183 = vrsqrt.f32 %v1718_v32  ;;  %v1709_v7 = vmul.f32 %v1705_v49, %v2273_v18  ;;  %vm1735_vm2 = vweird.f32 %v1718_v32 }
 0xef8   :  { %v1713_v52 = vsub.f32 %v1709_v7, %v1711_v50 }
 0xefa   :  { %v1717_v6 = vadd.f32 1e-05, %v1713_v52 }
 0xefc   :  { %v2184_v53 = vpop.eup %2183  ;;  %2185 = vrsqrt.f32 %v1717_v6  ;;  %vm1725_vm5 = vweird.f32 %v1717_v6 }
 0xefd   :  { %v1730_v11 = vmul.f32 %v2184_v53, %v1718_v32  ;;  %vm1736_vm1 = vweird.f32 %v2184_v53 }
 0xefe   :  { %vm1737_vm3 = vmor %vm1735_vm2, %vm1736_vm1 }
 0xeff   :  { %v1731_v54 = vmul.f32 %v2184_v53, %v1730_v11 }
 0xf01   :  { %v1732_v55 = vmul.f32 0.5, %v1731_v54 }
 0xf02   :  { %v2186_v1 = vpop.eup %2185 }
 0xf03   :  { %v1733_v2 = vsub.f32 1.5, %v1732_v55  ;;  %v1720_v3 = vmul.f32 %v2186_v1, %v1717_v6  ;;  %vm1726_vm4 = vweird.f32 %v2186_v1 }
 0xf04   :  { %vm1727_vm6 = vmor %vm1725_vm5, %vm1726_vm4 }
 0xf05   :  { %v1734_v17 = vmul.f32 %v2184_v53, %v1733_v2  ;;  %v1721_v4 = vmul.f32 %v2186_v1, %v1720_v3 }
 0xf07   :  { %v1738_v0 = vsel %vm1737_vm3, %v2184_v53, %v1734_v17  ;;  %v1722_v18 = vmul.f32 0.5, %v1721_v4 }
 0xf08   :  { %v1740_v14 = vmul.f32 %v1738_v0, %v1716_v12 }
 0xf09   :  { %v1723_v25 = vsub.f32 1.5, %v1722_v18 }
 0xf0a   :  { %v1743_v27 = vmul.f32 %v1741_v62, %v1740_v14 }
 0xf0b   :  { %v1724_v19 = vmul.f32 %v2186_v1, %v1723_v25 }
 0xf0c   :  { %v1746_v20 = vadd.f32 %v1744_v15, %v1743_v27 }
 0xf0d   :  { %v1728_v47 = vsel %vm1727_vm6, %v2186_v1, %v1724_v19 }
 0xf0e   :  { %v1739_v22 = vmul.f32 %v1728_v47, %v1715_v57  ;;  %v1750_v26 = vrot.slane %v1746_v20, 7 }
 0xf10   :  { %v1742_v24 = vmul.f32 %v1741_v62, %v1739_v22 }
 0xf12   :  { %v1745_v30 = vadd.f32 %v1744_v15, %v1742_v24 }
 0xf14   :  { %v1753_v58 = vsel %vm1752_vm7, %v1745_v30, %v1750_v26 }
 0xf15   :  { %v1754_v5 = vpack.c.bf16 %v1753_v58, %v1753_v58 }
 0xf17   :  { %2003 = vmatmul.msk.bf16.vlgmr.msra.gmra.mxu0 %vm49_vm0, %v1754_v5 }
 0xf94   :  { %v1784_v28 = vpop.f32.mrf.mxu0 }
 0xf95   :  { %v1785_v8 = vadd.f32 %v2091_v33, %v1784_v28 }
 0xf97   :  { %2187 = vtanh.f32 %v1785_v8 }
 0xf9c   :  { %v1786_v34 = vpop.f32.mrf.mxu0 }
 0xf9d   :  { %v2188_v10 = vpop.eup %2187 }
 0xf9e   :  { %v1789_v35 = vpack.c.bf16 %v2188_v10, %v2188_v10 }
 0xfa0   :  { %2016 = vmatmul.msk.bf16.vlgmr.msra.gmra.mxu1 %vm49_vm0, %v1789_v35 }
0x101d   :  { %v1820_v40 = vpop.f32.mrf.mxu1 }
0x101e   :  { %v1821_v36 = vadd.f32 %v2092_v23, %v1820_v40 }
0x1020   :  { %v2017_v60 = vmul.f32 -1.442695, %v1821_v36 }
0x1022   :  { %2189 = vpow2.f32 %v2017_v60 }
0x1025   :  { %v1822_v37 = vpop.f32.mrf.mxu1 }
0x1028   :  { %v2190_v38 = vpop.eup %2189 }
0x1029   :  { %v1827_v39 = vadd.f32 1.0, %v2190_v38 }
0x102b   :  { %2191 = vrcp.f32 %v1827_v39  ;;  %v1839_v29 = vand.u32 2147483648, %v1827_v39  ;;  %v1837_v48 = vand.u32 2147483647, %v1827_v39  ;;  %vm1833_vm0 = vweird.f32 %v1827_v39 }
0x102d   :  { %v1840_v46 = vor.u32 1.1754944e-38, %v1839_v29  ;;  %vm1838_vm8 = vcmp.eq.f32.partialorder %v1837_v48, 8.507059e+37 }
0x1031   :  { %v2192_v42 = vpop.eup %2191 }
0x1032   :  { %v1829_v43 = vmul.f32 %v2192_v42, %v1827_v39  ;;  %vm1834_vm12 = vweird.f32 %v2192_v42 }
0x1033   :  { %vm1835_vm13 = vmor %vm1833_vm0, %vm1834_vm12 }
0x1034   :  { %v1830_v44 = vsub.f32 1.0, %v1829_v43 }
0x1036   :  { %v1831_v51 = vmul.f32 %v2192_v42, %v1830_v44 }
0x1038   :  { %v1832_v13 = vadd.f32 %v2192_v42, %v1831_v51 }
0x103a   :  { %v1836_v9 = vsel %vm1835_vm13, %v2192_v42, %v1832_v13 }
0x103b   :  { %v1841_v21 = vsel %vm1838_vm8, %v1840_v46, %v1836_v9 }
0x103c   :  { %v1844_v63 = vrot.slane %v1841_v21, 6 }
0x103e   :  { %v1847_v41 = vsel %vm1846_vm9, %v2188_v10, %v1844_v63 }
0x103f   :  { %1849 = vst.msk [vmem:[%s2800_s9] sm:$0xf] %vm1848_vm10, %v1847_v41 }

</bundles_post_ra>
